<compile_context>
chip_gen: v7x
topology: tpu7x:2x2x1
jax: 0.10.0
libtpu: 0.0.40
codegen_flags: <defaults>
</compile_context>

<pallas_src>
import math
from functools import partial

import jax
import jax.numpy as jnp
from jax.experimental import pallas as pl
from jax.experimental.pallas import tpu as pltpu

# ----- small synthetic config (module default d_model=256 scaled down) -----
D_MODEL = 32
N_HEAD = 4
D_HEAD = D_MODEL // N_HEAD
D_FF = 64
N_LAYERS = 2
VOCAB = 128          # padded to a full 128-lane vreg -> lane-dense logits stores
EPS = 1e-5
NEG_INF = -1e9


# ----------------------------- fused Pallas kernel ------------------------------

def _layer_norm(x, g, b):
    mu = jnp.mean(x, axis=-1, keepdims=True)
    var = jnp.mean((x - mu) ** 2, axis=-1, keepdims=True)
    return (x - mu) * jax.lax.rsqrt(var + EPS) * g + b


def _fused_decoder_kernel(ids_ref, bias_ref, emb_ref, emb_t_ref,
                          wqkv_ref, bqkv_ref, wo_ref,
                          w1_ref, b1_ref, w2_ref, vecd_ref,
                          o_ref, *, seq):
    """One grid step = one batch element: (S, D) token slab end-to-end."""
    f32, bf16 = jnp.float32, jnp.bfloat16

    # ---- shared token embedding via one-hot MXU matmul (avoids gather, VOCAB==128) ----
    ids = ids_ref[...]                                                 # (S, 1) int32
    onehot = (jax.lax.broadcasted_iota(jnp.int32, (seq, VOCAB), 1) == ids).astype(bf16)
    x = jnp.dot(onehot, emb_ref[...],
                preferred_element_type=f32) * math.sqrt(D_MODEL)       # (S, D) f32
    x = x + bias_ref[...]                                              # + PE + latent (f32)

    # ---- causal mask: single (S, S) bool, broadcast over heads (no per-batch f32 slab) --
    row = jax.lax.broadcasted_iota(jnp.int32, (seq, seq), 0)
    col = jax.lax.broadcasted_iota(jnp.int32, (seq, seq), 1)
    causal = row >= col                                                # bool (S, S)

    scale = 1.0 / math.sqrt(D_HEAD)

    for l in range(N_LAYERS):                                          # static unrolled layers
        vp = vecd_ref[l]                                               # (6, D) f32
        bo, ln1g, ln1b = vp[0:1], vp[1:2], vp[2:3]
        b2, ln2g, ln2b = vp[3:4], vp[4:5], vp[5:6]

        # fused QKV projection over the whole (S, D) slab of this batch element
        qkv = jnp.dot(x.astype(bf16), wqkv_ref[l],
                      preferred_element_type=f32) + bqkv_ref[l]        # (S, 3D) f32

        # heads-leading layout -> one batched matmul pair for all heads (no per-head loop)
        qkv3 = jnp.swapaxes(qkv.reshape(seq, 3 * N_HEAD, D_HEAD), 0, 1)  # (3H, S, Dh) f32
        qh = (qkv3[:N_HEAD] * scale).astype(bf16)                      # fold scale into q
        kh = qkv3[N_HEAD:2 * N_HEAD].astype(bf16)
        vh = qkv3[2 * N_HEAD:].astype(bf16)

        s = jnp.einsum('hqd,hkd->hqk', qh, kh,
                       preferred_element_type=f32)                     # (H, S, S) f32
        s = jnp.where(causal[None, :, :], s, NEG_INF)                  # mask in f32
        s = s - jnp.max(s, axis=-1, keepdims=True)
        p = jnp.exp(s)
        denom = jnp.sum(p, axis=-1, keepdims=True)                     # (H, S, 1) f32
        # deferred normalization: scale the (H,S,Dh) output, not the (H,S,S) probabilities
        oh = jnp.einsum('hqk,hkd->hqd', p.astype(bf16), vh,
                        preferred_element_type=f32)                    # (H, S, Dh) f32
        oh = oh * pl.reciprocal(denom, approx=True)                    # EUP, not VALU divide
        attn = jnp.swapaxes(oh, 0, 1).reshape(seq, D_MODEL)            # (S, D)

        attn = jnp.dot(attn.astype(bf16), wo_ref[l],
                       preferred_element_type=f32) + bo
        h1 = _layer_norm(x + attn, ln1g, ln1b)

        ff = jnp.dot(h1.astype(bf16), w1_ref[l],
                     preferred_element_type=f32) + b1_ref[l]
        ff = jnp.maximum(ff, 0.0)
        ff = jnp.dot(ff.astype(bf16), w2_ref[l],
                     preferred_element_type=f32) + b2
        x = _layer_norm(h1 + ff, ln2g, ln2b)

    # shared-embedding logits with a PRE-TRANSPOSED (D, V) weight: no in-kernel transpose,
    # lane-dense 128-wide store.
    o_ref[...] = jnp.dot(x.astype(bf16), emb_t_ref[...],
                         preferred_element_type=f32)


# ------------------------------ Pallas wrapper -----------------------------------

def _cost_estimate(B, S):
    BS = B * S
    flops = 2 * BS * VOCAB * D_MODEL                           # one-hot embedding matmul
    per_layer = (2 * BS * D_MODEL * 3 * D_MODEL                # QKV proj
                 + 2 * 2 * B * N_HEAD * S * S * D_HEAD         # QK^T and P@V
                 + 2 * BS * D_MODEL * D_MODEL                  # output proj
                 + 2 * 2 * BS * D_MODEL * D_FF)                # FFN
    flops += N_LAYERS * per_layer
    flops += 2 * BS * D_MODEL * VOCAB                          # logits
    transcendentals = N_LAYERS * (B * N_HEAD * S * S           # exp
                                  + B * N_HEAD * S             # approx reciprocal
                                  + 2 * BS)                    # rsqrt (2 LayerNorms)
    bytes_accessed = (BS * 4                                   # ids
                      + BS * D_MODEL * 4                       # PE + latent bias
                      + 2 * VOCAB * D_MODEL * 2                # emb + emb^T (bf16)
                      + N_LAYERS * (D_MODEL * 3 * D_MODEL + D_MODEL * D_MODEL
                                    + 2 * D_MODEL * D_FF) * 2  # bf16 weights
                      + N_LAYERS * (3 * D_MODEL + D_FF + 6 * D_MODEL) * 4  # f32 vectors
                      + BS * VOCAB * 4)                        # logits out
    return pl.CostEstimate(flops=flops, transcendentals=transcendentals,
                           bytes_accessed=bytes_accessed)


def _fused_forward(B, S):
    kernel = partial(_fused_decoder_kernel, seq=S)

    def full(shape):                                           # whole-array, grid-invariant
        return pl.BlockSpec(shape, lambda b, _n=len(shape): (0,) * _n)

    return pl.pallas_call(
        kernel,
        grid=(B,),                                             # one batch element per step
        in_specs=[
            pl.BlockSpec((None, S, 1), lambda b: (b, 0, 0)),          # ids
            pl.BlockSpec((None, S, D_MODEL), lambda b: (b, 0, 0)),    # PE + latent bias
            full((VOCAB, D_MODEL)),                                   # emb (bf16)
            full((D_MODEL, VOCAB)),                                   # emb^T (bf16)
            full((N_LAYERS, D_MODEL, 3 * D_MODEL)),                   # wqkv
            full((N_LAYERS, 1, 3 * D_MODEL)),                         # bqkv
            full((N_LAYERS, D_MODEL, D_MODEL)),                       # wo
            full((N_LAYERS, D_MODEL, D_FF)),                          # w1
            full((N_LAYERS, 1, D_FF)),                                # b1
            full((N_LAYERS, D_FF, D_MODEL)),                          # w2
            full((N_LAYERS, 6, D_MODEL)),                             # packed bias/LN vectors
        ],
        out_specs=pl.BlockSpec((None, S, VOCAB), lambda b: (b, 0, 0)),
        out_shape=jax.ShapeDtypeStruct((B, S, VOCAB), jnp.float32),
        cost_estimate=_cost_estimate(B, S),
        compiler_params=pltpu.CompilerParams(
            dimension_semantics=("parallel",),   # shard batch across v7x's 2 TensorCores
            vmem_limit_bytes=32 * 1024 * 1024,   # overrides v5e's 16 MiB scoped default
        ),
    )


# -------------------------- model glue (plain JAX) --------------------------------

def _sinusoid_pe(position, d):
    # classic interleaved sin/cos PE driven by *float* positions
    # TODO(synk): exact SeqShareVAE positional-encoding layout unknown; stand-in.
    i = jnp.arange(d // 2, dtype=jnp.float32)
    inv_freq = jnp.exp(-(math.log(10000.0)) * (2.0 * i) / d)          # (d/2,)
    ang = position[..., None] * inv_freq                              # (B, S, d/2)
    pe = jnp.stack([jnp.sin(ang), jnp.cos(ang)], axis=-1)             # (B, S, d/2, 2)
    return pe.reshape(position.shape[0], position.shape[1], d)


def init_params(key):
    ks = jax.random.split(key, 5)
    s = 0.02
    f32 = jnp.float32
    return {
        'emb':  jax.random.normal(ks[0], (VOCAB, D_MODEL), f32) * s,
        'wqkv': jax.random.normal(ks[1], (N_LAYERS, D_MODEL, 3 * D_MODEL), f32) * s,
        'wo':   jax.random.normal(ks[2], (N_LAYERS, D_MODEL, D_MODEL), f32) * s,
        'w1':   jax.random.normal(ks[3], (N_LAYERS, D_MODEL, D_FF), f32) * s,
        'w2':   jax.random.normal(ks[4], (N_LAYERS, D_FF, D_MODEL), f32) * s,
        'bqkv': jnp.zeros((N_LAYERS, 1, 3 * D_MODEL), f32),
        'b1':   jnp.zeros((N_LAYERS, 1, D_FF), f32),
        # packed per-layer vectors: rows = [bo, ln1_g, ln1_b, b2, ln2_g, ln2_b]
        'vecd': jnp.tile(
            jnp.stack([jnp.zeros(D_MODEL, f32), jnp.ones(D_MODEL, f32),
                       jnp.zeros(D_MODEL, f32), jnp.zeros(D_MODEL, f32),
                       jnp.ones(D_MODEL, f32), jnp.zeros(D_MODEL, f32)])[None],
            (N_LAYERS, 1, 1)),
    }


@jax.jit
def graph_paraff_encoder_decoder(params, input_ids, position, latent):
    """forward(input_ids, position, latent) -> word_decoder(input_ids, position.float(), latent)"""
    B, S = input_ids.shape
    position = position.astype(jnp.float32)                            # position.float()
    # additive stream bias = positional encoding + broadcast latent (layout plumbing only)
    bias = _sinusoid_pe(position, D_MODEL) + latent[:, None, :]        # (B, S, D)
    bf = jnp.bfloat16
    emb_bf = params['emb'].astype(bf)
    logits = _fused_forward(B, S)(
        input_ids.reshape(B, S, 1).astype(jnp.int32),
        bias.astype(jnp.float32),
        emb_bf,
        emb_bf.T,                                   # pre-transposed for logits projection
        params['wqkv'].astype(bf), params['bqkv'],
        params['wo'].astype(bf),
        params['w1'].astype(bf), params['b1'],
        params['w2'].astype(bf),
        params['vecd'],
    )
    return logits                                                      # (B, S, VOCAB)


# ----------------------------------- main ------------------------------------------

if __name__ == "__main__":
    key = jax.random.PRNGKey(0)
    k_param, k_ids, k_lat = jax.random.split(key, 3)

    B, S = 2, 8
    params = init_params(k_param)
    input_ids = jax.random.randint(k_ids, (B, S), 0, VOCAB, dtype=jnp.int32)
    position = jnp.broadcast_to(jnp.arange(S, dtype=jnp.int32), (B, S))
    latent = jax.random.normal(k_lat, (B, D_MODEL), jnp.float32)

    logits = graph_paraff_encoder_decoder(params, input_ids, position, latent)
    jax.block_until_ready(logits)
    assert logits.shape == (B, S, VOCAB) and logits.dtype == jnp.float32
    assert bool(jnp.all(jnp.isfinite(logits)))
    print("KERNEL_OK")
</pallas_src>

<mosaic_0001>
module attributes {stable_mosaic.version = 11 : i64} {
  func.func @_fused_decoder_kernel(%arg0: i32, %arg1: memref<1x8x1xi32, #tpu.memory_space<vmem>>, %arg2: memref<1x8x32xf32, #tpu.memory_space<vmem>>, %arg3: memref<128x32xbf16, #tpu.memory_space<vmem>>, %arg4: memref<32x128xbf16, #tpu.memory_space<vmem>>, %arg5: memref<2x32x96xbf16, #tpu.memory_space<vmem>>, %arg6: memref<2x1x96xf32, #tpu.memory_space<vmem>>, %arg7: memref<2x32x32xbf16, #tpu.memory_space<vmem>>, %arg8: memref<2x32x64xbf16, #tpu.memory_space<vmem>>, %arg9: memref<2x1x64xf32, #tpu.memory_space<vmem>>, %arg10: memref<2x64x32xbf16, #tpu.memory_space<vmem>>, %arg11: memref<2x6x32xf32, #tpu.memory_space<vmem>>, %arg12: memref<1x8x128xf32, #tpu.memory_space<vmem>>) attributes {dimension_semantics = [#tpu.dimension_semantics<parallel>], iteration_bounds = array<i64: 2>, scalar_prefetch = 0 : i64, scratch_operands = 0 : i64, tpu.core_type = #tpu.core_type<tc>, window_params = [{transform_indices = @transform_0, window_bounds = array<i64: 1, 8, 1>}, {transform_indices = @transform_1, window_bounds = array<i64: 1, 8, 32>}, {pipeline_mode = #tpu.pipeline_mode<synchronous>, transform_indices = @transform_2, window_bounds = array<i64: 128, 32>}, {pipeline_mode = #tpu.pipeline_mode<synchronous>, transform_indices = @transform_3, window_bounds = array<i64: 32, 128>}, {pipeline_mode = #tpu.pipeline_mode<synchronous>, transform_indices = @transform_4, window_bounds = array<i64: 2, 32, 96>}, {pipeline_mode = #tpu.pipeline_mode<synchronous>, transform_indices = @transform_5, window_bounds = array<i64: 2, 1, 96>}, {pipeline_mode = #tpu.pipeline_mode<synchronous>, transform_indices = @transform_6, window_bounds = array<i64: 2, 32, 32>}, {pipeline_mode = #tpu.pipeline_mode<synchronous>, transform_indices = @transform_7, window_bounds = array<i64: 2, 32, 64>}, {pipeline_mode = #tpu.pipeline_mode<synchronous>, transform_indices = @transform_8, window_bounds = array<i64: 2, 1, 64>}, {pipeline_mode = #tpu.pipeline_mode<synchronous>, transform_indices = @transform_9, window_bounds = array<i64: 2, 64, 32>}, {pipeline_mode = #tpu.pipeline_mode<synchronous>, transform_indices = @transform_10, window_bounds = array<i64: 2, 6, 32>}, {transform_indices = @transform_11, window_bounds = array<i64: 1, 8, 128>}]} {
    %c0 = arith.constant 0 : index
    %c0_0 = arith.constant 0 : index
    %c0_1 = arith.constant 0 : index
    %0 = vector.load %arg1[%c0, %c0_0, %c0_1] : memref<1x8x1xi32, #tpu.memory_space<vmem>>, vector<1x8x1xi32>
    %1 = vector.shape_cast %0 : vector<1x8x1xi32> to vector<8x1xi32>
    %2 = tpu.iota {dimensions = array<i32: 1>} : vector<8x128xi32>
    %3 = vector.broadcast %1 : vector<8x1xi32> to vector<8x128xi32>
    %4 = arith.cmpi eq, %2, %3 : vector<8x128xi32>
    %5 = arith.extui %4 : vector<8x128xi1> to vector<8x128xi32>
    %6 = arith.sitofp %5 : vector<8x128xi32> to vector<8x128xf32>
    %7 = arith.truncf %6 : vector<8x128xf32> to vector<8x128xbf16>
    %c0_2 = arith.constant 0 : index
    %c0_3 = arith.constant 0 : index
    %8 = vector.load %arg3[%c0_2, %c0_3] : memref<128x32xbf16, #tpu.memory_space<vmem>>, vector<128x32xbf16>
    %cst = arith.constant dense<0.000000e+00> : vector<8x32xf32>
    %9 = tpu.matmul %7, %8, %cst {dimension_numbers = #tpu.dot_dimension_numbers<[1], [0], [0], [1], [0, 0, 1, 1], [], []>} : vector<8x128xbf16>, vector<128x32xbf16>, vector<8x32xf32> -> vector<8x32xf32>
    %cst_4 = arith.constant 5.65685415 : f32
    %10 = vector.broadcast %cst_4 : f32 to vector<8x32xf32>
    %11 = arith.mulf %9, %10 : vector<8x32xf32>
    %c0_5 = arith.constant 0 : index
    %c0_6 = arith.constant 0 : index
    %c0_7 = arith.constant 0 : index
    %12 = vector.load %arg2[%c0_5, %c0_6, %c0_7] : memref<1x8x32xf32, #tpu.memory_space<vmem>>, vector<1x8x32xf32>
    %13 = vector.shape_cast %12 : vector<1x8x32xf32> to vector<8x32xf32>
    %14 = arith.addf %11, %13 : vector<8x32xf32>
    %15 = tpu.iota {dimensions = array<i32: 0>} : vector<8x8xi32>
    %16 = tpu.iota {dimensions = array<i32: 1>} : vector<8x8xi32>
    %17 = arith.cmpi sge, %15, %16 : vector<8x8xi32>
    %c0_8 = arith.constant 0 : index
    %c0_9 = arith.constant 0 : index
    %c0_10 = arith.constant 0 : index
    %18 = vector.load %arg11[%c0_8, %c0_9, %c0_10] : memref<2x6x32xf32, #tpu.memory_space<vmem>>, vector<1x6x32xf32>
    %19 = vector.shape_cast %18 : vector<1x6x32xf32> to vector<6x32xf32>
    %20 = vector.extract_strided_slice %19 {offsets = [0, 0], sizes = [1, 32], strides = [1, 1]} : vector<6x32xf32> to vector<1x32xf32>
    %21 = vector.extract_strided_slice %19 {offsets = [1, 0], sizes = [1, 32], strides = [1, 1]} : vector<6x32xf32> to vector<1x32xf32>
    %22 = vector.extract_strided_slice %19 {offsets = [2, 0], sizes = [1, 32], strides = [1, 1]} : vector<6x32xf32> to vector<1x32xf32>
    %23 = vector.extract_strided_slice %19 {offsets = [3, 0], sizes = [1, 32], strides = [1, 1]} : vector<6x32xf32> to vector<1x32xf32>
    %24 = vector.extract_strided_slice %19 {offsets = [4, 0], sizes = [1, 32], strides = [1, 1]} : vector<6x32xf32> to vector<1x32xf32>
    %25 = vector.extract_strided_slice %19 {offsets = [5, 0], sizes = [1, 32], strides = [1, 1]} : vector<6x32xf32> to vector<1x32xf32>
    %26 = arith.truncf %14 : vector<8x32xf32> to vector<8x32xbf16>
    %c0_11 = arith.constant 0 : index
    %c0_12 = arith.constant 0 : index
    %c0_13 = arith.constant 0 : index
    %27 = vector.load %arg5[%c0_11, %c0_12, %c0_13] : memref<2x32x96xbf16, #tpu.memory_space<vmem>>, vector<1x32x96xbf16>
    %28 = vector.shape_cast %27 : vector<1x32x96xbf16> to vector<32x96xbf16>
    %cst_14 = arith.constant dense<0.000000e+00> : vector<8x96xf32>
    %29 = tpu.matmul %26, %28, %cst_14 {dimension_numbers = #tpu.dot_dimension_numbers<[1], [0], [0], [1], [0, 0, 1, 1], [], []>} : vector<8x32xbf16>, vector<32x96xbf16>, vector<8x96xf32> -> vector<8x96xf32>
    %c0_15 = arith.constant 0 : index
    %c0_16 = arith.constant 0 : index
    %c0_17 = arith.constant 0 : index
    %30 = vector.load %arg6[%c0_15, %c0_16, %c0_17] : memref<2x1x96xf32, #tpu.memory_space<vmem>>, vector<1x1x96xf32>
    %31 = vector.shape_cast %30 : vector<1x1x96xf32> to vector<1x96xf32>
    %32 = vector.broadcast %31 : vector<1x96xf32> to vector<8x96xf32>
    %33 = arith.addf %29, %32 : vector<8x96xf32>
    %34 = vector.shape_cast %33 : vector<8x96xf32> to vector<8x12x8xf32>
    %35 = tpu.transpose %34, [1, 0, 2] : vector<8x12x8xf32> -> vector<12x8x8xf32>
    %36 = vector.extract_strided_slice %35 {offsets = [0, 0, 0], sizes = [4, 8, 8], strides = [1, 1, 1]} : vector<12x8x8xf32> to vector<4x8x8xf32>
    %cst_18 = arith.constant 0.353553385 : f32
    %37 = vector.broadcast %cst_18 : f32 to vector<4x8x8xf32>
    %38 = arith.mulf %36, %37 : vector<4x8x8xf32>
    %39 = arith.truncf %38 : vector<4x8x8xf32> to vector<4x8x8xbf16>
    %40 = vector.extract_strided_slice %35 {offsets = [4, 0, 0], sizes = [4, 8, 8], strides = [1, 1, 1]} : vector<12x8x8xf32> to vector<4x8x8xf32>
    %41 = arith.truncf %40 : vector<4x8x8xf32> to vector<4x8x8xbf16>
    %42 = vector.extract_strided_slice %35 {offsets = [8, 0, 0], sizes = [4, 8, 8], strides = [1, 1, 1]} : vector<12x8x8xf32> to vector<4x8x8xf32>
    %43 = arith.truncf %42 : vector<4x8x8xf32> to vector<4x8x8xbf16>
    "tpu.trace_start"() <{level = 10 : i32, message = "hqd,hkd->hqk"}> : () -> ()
    %cst_19 = arith.constant dense<0.000000e+00> : vector<4x8x8xf32>
    %44 = tpu.matmul %39, %41, %cst_19 {dimension_numbers = #tpu.dot_dimension_numbers<[2], [2], [1], [1], [0, 0, 0, 1, 1, 1], [0], [0]>} : vector<4x8x8xbf16>, vector<4x8x8xbf16>, vector<4x8x8xf32> -> vector<4x8x8xf32>
    "tpu.trace_stop"() : () -> ()
    %45 = vector.shape_cast %17 : vector<8x8xi1> to vector<1x8x8xi1>
    %cst_20 = arith.constant -1.000000e+09 : f32
    %46 = vector.shape_cast %45 : vector<1x8x8xi1> to vector<1x8x8xi1>
    %47 = vector.broadcast %46 : vector<1x8x8xi1> to vector<4x8x8xi1>
    %48 = vector.broadcast %cst_20 : f32 to vector<4x8x8xf32>
    %49 = arith.select %47, %44, %48 : vector<4x8x8xi1>, vector<4x8x8xf32>
    %cst_21 = arith.constant dense<0xFF800000> : vector<4x8xf32>
    %50 = vector.multi_reduction <maximumf>, %49, %cst_21 [2] : vector<4x8x8xf32> to vector<4x8xf32>
    %51 = vector.shape_cast %50 : vector<4x8xf32> to vector<4x8x1xf32>
    %52 = vector.broadcast %51 : vector<4x8x1xf32> to vector<4x8x8xf32>
    %53 = arith.subf %49, %52 : vector<4x8x8xf32>
    %54 = math.exp %53 : vector<4x8x8xf32>
    %cst_22 = arith.constant dense<0.000000e+00> : vector<4x8xf32>
    %55 = vector.multi_reduction <add>, %54, %cst_22 [2] : vector<4x8x8xf32> to vector<4x8xf32>
    %56 = vector.shape_cast %55 : vector<4x8xf32> to vector<4x8x1xf32>
    %57 = arith.truncf %54 : vector<4x8x8xf32> to vector<4x8x8xbf16>
    "tpu.trace_start"() <{level = 10 : i32, message = "hqk,hkd->hqd"}> : () -> ()
    %cst_23 = arith.constant dense<0.000000e+00> : vector<4x8x8xf32>
    %58 = tpu.matmul %57, %43, %cst_23 {dimension_numbers = #tpu.dot_dimension_numbers<[2], [1], [1], [2], [0, 0, 0, 1, 1, 2], [0], [0]>} : vector<4x8x8xbf16>, vector<4x8x8xbf16>, vector<4x8x8xf32> -> vector<4x8x8xf32>
    "tpu.trace_stop"() : () -> ()
    %59 = tpu.reciprocal %56 {approx = true} : vector<4x8x1xf32> -> vector<4x8x1xf32>
    %60 = vector.broadcast %59 : vector<4x8x1xf32> to vector<4x8x8xf32>
    %61 = arith.mulf %58, %60 : vector<4x8x8xf32>
    %62 = tpu.transpose %61, [1, 0, 2] : vector<4x8x8xf32> -> vector<8x4x8xf32>
    %63 = vector.shape_cast %62 : vector<8x4x8xf32> to vector<8x32xf32>
    %64 = arith.truncf %63 : vector<8x32xf32> to vector<8x32xbf16>
    %c0_24 = arith.constant 0 : index
    %c0_25 = arith.constant 0 : index
    %c0_26 = arith.constant 0 : index
    %65 = vector.load %arg7[%c0_24, %c0_25, %c0_26] : memref<2x32x32xbf16, #tpu.memory_space<vmem>>, vector<1x32x32xbf16>
    %66 = vector.shape_cast %65 : vector<1x32x32xbf16> to vector<32x32xbf16>
    %cst_27 = arith.constant dense<0.000000e+00> : vector<8x32xf32>
    %67 = tpu.matmul %64, %66, %cst_27 {dimension_numbers = #tpu.dot_dimension_numbers<[1], [0], [0], [1], [0, 0, 1, 1], [], []>} : vector<8x32xbf16>, vector<32x32xbf16>, vector<8x32xf32> -> vector<8x32xf32>
    %68 = vector.broadcast %20 : vector<1x32xf32> to vector<8x32xf32>
    %69 = arith.addf %67, %68 : vector<8x32xf32>
    %70 = arith.addf %14, %69 : vector<8x32xf32>
    %cst_28 = arith.constant dense<0.000000e+00> : vector<8xf32>
    %71 = vector.multi_reduction <add>, %70, %cst_28 [1] : vector<8x32xf32> to vector<8xf32>
    %72 = vector.shape_cast %71 : vector<8xf32> to vector<8x1xf32>
    %cst_29 = arith.constant 3.200000e+01 : f32
    %73 = vector.broadcast %cst_29 : f32 to vector<8x1xf32>
    %74 = arith.divf %72, %73 : vector<8x1xf32>
    %75 = vector.broadcast %74 : vector<8x1xf32> to vector<8x32xf32>
    %76 = arith.subf %70, %75 : vector<8x32xf32>
    %77 = arith.mulf %76, %76 : vector<8x32xf32>
    %cst_30 = arith.constant dense<0.000000e+00> : vector<8xf32>
    %78 = vector.multi_reduction <add>, %77, %cst_30 [1] : vector<8x32xf32> to vector<8xf32>
    %79 = vector.shape_cast %78 : vector<8xf32> to vector<8x1xf32>
    %cst_31 = arith.constant 3.200000e+01 : f32
    %80 = vector.broadcast %cst_31 : f32 to vector<8x1xf32>
    %81 = arith.divf %79, %80 : vector<8x1xf32>
    %82 = vector.broadcast %74 : vector<8x1xf32> to vector<8x32xf32>
    %83 = arith.subf %70, %82 : vector<8x32xf32>
    %cst_32 = arith.constant 9.99999974E-6 : f32
    %84 = vector.broadcast %cst_32 : f32 to vector<8x1xf32>
    %85 = arith.addf %81, %84 : vector<8x1xf32>
    %86 = math.rsqrt %85 : vector<8x1xf32>
    %87 = vector.broadcast %86 : vector<8x1xf32> to vector<8x32xf32>
    %88 = arith.mulf %83, %87 : vector<8x32xf32>
    %89 = vector.broadcast %21 : vector<1x32xf32> to vector<8x32xf32>
    %90 = arith.mulf %88, %89 : vector<8x32xf32>
    %91 = vector.broadcast %22 : vector<1x32xf32> to vector<8x32xf32>
    %92 = arith.addf %90, %91 : vector<8x32xf32>
    %93 = arith.truncf %92 : vector<8x32xf32> to vector<8x32xbf16>
    %c0_33 = arith.constant 0 : index
    %c0_34 = arith.constant 0 : index
    %c0_35 = arith.constant 0 : index
    %94 = vector.load %arg8[%c0_33, %c0_34, %c0_35] : memref<2x32x64xbf16, #tpu.memory_space<vmem>>, vector<1x32x64xbf16>
    %95 = vector.shape_cast %94 : vector<1x32x64xbf16> to vector<32x64xbf16>
    %cst_36 = arith.constant dense<0.000000e+00> : vector<8x64xf32>
    %96 = tpu.matmul %93, %95, %cst_36 {dimension_numbers = #tpu.dot_dimension_numbers<[1], [0], [0], [1], [0, 0, 1, 1], [], []>} : vector<8x32xbf16>, vector<32x64xbf16>, vector<8x64xf32> -> vector<8x64xf32>
    %c0_37 = arith.constant 0 : index
    %c0_38 = arith.constant 0 : index
    %c0_39 = arith.constant 0 : index
    %97 = vector.load %arg9[%c0_37, %c0_38, %c0_39] : memref<2x1x64xf32, #tpu.memory_space<vmem>>, vector<1x1x64xf32>
    %98 = vector.shape_cast %97 : vector<1x1x64xf32> to vector<1x64xf32>
    %99 = vector.broadcast %98 : vector<1x64xf32> to vector<8x64xf32>
    %100 = arith.addf %96, %99 : vector<8x64xf32>
    %cst_40 = arith.constant 0.000000e+00 : f32
    %101 = vector.broadcast %cst_40 : f32 to vector<8x64xf32>
    %102 = arith.maximumf %100, %101 : vector<8x64xf32>
    %103 = arith.truncf %102 : vector<8x64xf32> to vector<8x64xbf16>
    %c0_41 = arith.constant 0 : index
    %c0_42 = arith.constant 0 : index
    %c0_43 = arith.constant 0 : index
    %104 = vector.load %arg10[%c0_41, %c0_42, %c0_43] : memref<2x64x32xbf16, #tpu.memory_space<vmem>>, vector<1x64x32xbf16>
    %105 = vector.shape_cast %104 : vector<1x64x32xbf16> to vector<64x32xbf16>
    %cst_44 = arith.constant dense<0.000000e+00> : vector<8x32xf32>
    %106 = tpu.matmul %103, %105, %cst_44 {dimension_numbers = #tpu.dot_dimension_numbers<[1], [0], [0], [1], [0, 0, 1, 1], [], []>} : vector<8x64xbf16>, vector<64x32xbf16>, vector<8x32xf32> -> vector<8x32xf32>
    %107 = vector.broadcast %23 : vector<1x32xf32> to vector<8x32xf32>
    %108 = arith.addf %106, %107 : vector<8x32xf32>
    %109 = arith.addf %92, %108 : vector<8x32xf32>
    %cst_45 = arith.constant dense<0.000000e+00> : vector<8xf32>
    %110 = vector.multi_reduction <add>, %109, %cst_45 [1] : vector<8x32xf32> to vector<8xf32>
    %111 = vector.shape_cast %110 : vector<8xf32> to vector<8x1xf32>
    %cst_46 = arith.constant 3.200000e+01 : f32
    %112 = vector.broadcast %cst_46 : f32 to vector<8x1xf32>
    %113 = arith.divf %111, %112 : vector<8x1xf32>
    %114 = vector.broadcast %113 : vector<8x1xf32> to vector<8x32xf32>
    %115 = arith.subf %109, %114 : vector<8x32xf32>
    %116 = arith.mulf %115, %115 : vector<8x32xf32>
    %cst_47 = arith.constant dense<0.000000e+00> : vector<8xf32>
    %117 = vector.multi_reduction <add>, %116, %cst_47 [1] : vector<8x32xf32> to vector<8xf32>
    %118 = vector.shape_cast %117 : vector<8xf32> to vector<8x1xf32>
    %cst_48 = arith.constant 3.200000e+01 : f32
    %119 = vector.broadcast %cst_48 : f32 to vector<8x1xf32>
    %120 = arith.divf %118, %119 : vector<8x1xf32>
    %121 = vector.broadcast %113 : vector<8x1xf32> to vector<8x32xf32>
    %122 = arith.subf %109, %121 : vector<8x32xf32>
    %cst_49 = arith.constant 9.99999974E-6 : f32
    %123 = vector.broadcast %cst_49 : f32 to vector<8x1xf32>
    %124 = arith.addf %120, %123 : vector<8x1xf32>
    %125 = math.rsqrt %124 : vector<8x1xf32>
    %126 = vector.broadcast %125 : vector<8x1xf32> to vector<8x32xf32>
    %127 = arith.mulf %122, %126 : vector<8x32xf32>
    %128 = vector.broadcast %24 : vector<1x32xf32> to vector<8x32xf32>
    %129 = arith.mulf %127, %128 : vector<8x32xf32>
    %130 = vector.broadcast %25 : vector<1x32xf32> to vector<8x32xf32>
    %131 = arith.addf %129, %130 : vector<8x32xf32>
    %c1 = arith.constant 1 : index
    %c0_50 = arith.constant 0 : index
    %c0_51 = arith.constant 0 : index
    %132 = vector.load %arg11[%c1, %c0_50, %c0_51] : memref<2x6x32xf32, #tpu.memory_space<vmem>>, vector<1x6x32xf32>
    %133 = vector.shape_cast %132 : vector<1x6x32xf32> to vector<6x32xf32>
    %134 = vector.extract_strided_slice %133 {offsets = [0, 0], sizes = [1, 32], strides = [1, 1]} : vector<6x32xf32> to vector<1x32xf32>
    %135 = vector.extract_strided_slice %133 {offsets = [1, 0], sizes = [1, 32], strides = [1, 1]} : vector<6x32xf32> to vector<1x32xf32>
    %136 = vector.extract_strided_slice %133 {offsets = [2, 0], sizes = [1, 32], strides = [1, 1]} : vector<6x32xf32> to vector<1x32xf32>
    %137 = vector.extract_strided_slice %133 {offsets = [3, 0], sizes = [1, 32], strides = [1, 1]} : vector<6x32xf32> to vector<1x32xf32>
    %138 = vector.extract_strided_slice %133 {offsets = [4, 0], sizes = [1, 32], strides = [1, 1]} : vector<6x32xf32> to vector<1x32xf32>
    %139 = vector.extract_strided_slice %133 {offsets = [5, 0], sizes = [1, 32], strides = [1, 1]} : vector<6x32xf32> to vector<1x32xf32>
    %140 = arith.truncf %131 : vector<8x32xf32> to vector<8x32xbf16>
    %c1_52 = arith.constant 1 : index
    %c0_53 = arith.constant 0 : index
    %c0_54 = arith.constant 0 : index
    %141 = vector.load %arg5[%c1_52, %c0_53, %c0_54] : memref<2x32x96xbf16, #tpu.memory_space<vmem>>, vector<1x32x96xbf16>
    %142 = vector.shape_cast %141 : vector<1x32x96xbf16> to vector<32x96xbf16>
    %cst_55 = arith.constant dense<0.000000e+00> : vector<8x96xf32>
    %143 = tpu.matmul %140, %142, %cst_55 {dimension_numbers = #tpu.dot_dimension_numbers<[1], [0], [0], [1], [0, 0, 1, 1], [], []>} : vector<8x32xbf16>, vector<32x96xbf16>, vector<8x96xf32> -> vector<8x96xf32>
    %c1_56 = arith.constant 1 : index
    %c0_57 = arith.constant 0 : index
    %c0_58 = arith.constant 0 : index
    %144 = vector.load %arg6[%c1_56, %c0_57, %c0_58] : memref<2x1x96xf32, #tpu.memory_space<vmem>>, vector<1x1x96xf32>
    %145 = vector.shape_cast %144 : vector<1x1x96xf32> to vector<1x96xf32>
    %146 = vector.broadcast %145 : vector<1x96xf32> to vector<8x96xf32>
    %147 = arith.addf %143, %146 : vector<8x96xf32>
    %148 = vector.shape_cast %147 : vector<8x96xf32> to vector<8x12x8xf32>
    %149 = tpu.transpose %148, [1, 0, 2] : vector<8x12x8xf32> -> vector<12x8x8xf32>
    %150 = vector.extract_strided_slice %149 {offsets = [0, 0, 0], sizes = [4, 8, 8], strides = [1, 1, 1]} : vector<12x8x8xf32> to vector<4x8x8xf32>
    %cst_59 = arith.constant 0.353553385 : f32
    %151 = vector.broadcast %cst_59 : f32 to vector<4x8x8xf32>
    %152 = arith.mulf %150, %151 : vector<4x8x8xf32>
    %153 = arith.truncf %152 : vector<4x8x8xf32> to vector<4x8x8xbf16>
    %154 = vector.extract_strided_slice %149 {offsets = [4, 0, 0], sizes = [4, 8, 8], strides = [1, 1, 1]} : vector<12x8x8xf32> to vector<4x8x8xf32>
    %155 = arith.truncf %154 : vector<4x8x8xf32> to vector<4x8x8xbf16>
    %156 = vector.extract_strided_slice %149 {offsets = [8, 0, 0], sizes = [4, 8, 8], strides = [1, 1, 1]} : vector<12x8x8xf32> to vector<4x8x8xf32>
    %157 = arith.truncf %156 : vector<4x8x8xf32> to vector<4x8x8xbf16>
    "tpu.trace_start"() <{level = 10 : i32, message = "hqd,hkd->hqk"}> : () -> ()
    %cst_60 = arith.constant dense<0.000000e+00> : vector<4x8x8xf32>
    %158 = tpu.matmul %153, %155, %cst_60 {dimension_numbers = #tpu.dot_dimension_numbers<[2], [2], [1], [1], [0, 0, 0, 1, 1, 1], [0], [0]>} : vector<4x8x8xbf16>, vector<4x8x8xbf16>, vector<4x8x8xf32> -> vector<4x8x8xf32>
    "tpu.trace_stop"() : () -> ()
    %159 = vector.shape_cast %17 : vector<8x8xi1> to vector<1x8x8xi1>
    %cst_61 = arith.constant -1.000000e+09 : f32
    %160 = vector.shape_cast %159 : vector<1x8x8xi1> to vector<1x8x8xi1>
    %161 = vector.broadcast %160 : vector<1x8x8xi1> to vector<4x8x8xi1>
    %162 = vector.broadcast %cst_61 : f32 to vector<4x8x8xf32>
    %163 = arith.select %161, %158, %162 : vector<4x8x8xi1>, vector<4x8x8xf32>
    %cst_62 = arith.constant dense<0xFF800000> : vector<4x8xf32>
    %164 = vector.multi_reduction <maximumf>, %163, %cst_62 [2] : vector<4x8x8xf32> to vector<4x8xf32>
    %165 = vector.shape_cast %164 : vector<4x8xf32> to vector<4x8x1xf32>
    %166 = vector.broadcast %165 : vector<4x8x1xf32> to vector<4x8x8xf32>
    %167 = arith.subf %163, %166 : vector<4x8x8xf32>
    %168 = math.exp %167 : vector<4x8x8xf32>
    %cst_63 = arith.constant dense<0.000000e+00> : vector<4x8xf32>
    %169 = vector.multi_reduction <add>, %168, %cst_63 [2] : vector<4x8x8xf32> to vector<4x8xf32>
    %170 = vector.shape_cast %169 : vector<4x8xf32> to vector<4x8x1xf32>
    %171 = arith.truncf %168 : vector<4x8x8xf32> to vector<4x8x8xbf16>
    "tpu.trace_start"() <{level = 10 : i32, message = "hqk,hkd->hqd"}> : () -> ()
    %cst_64 = arith.constant dense<0.000000e+00> : vector<4x8x8xf32>
    %172 = tpu.matmul %171, %157, %cst_64 {dimension_numbers = #tpu.dot_dimension_numbers<[2], [1], [1], [2], [0, 0, 0, 1, 1, 2], [0], [0]>} : vector<4x8x8xbf16>, vector<4x8x8xbf16>, vector<4x8x8xf32> -> vector<4x8x8xf32>
    "tpu.trace_stop"() : () -> ()
    %173 = tpu.reciprocal %170 {approx = true} : vector<4x8x1xf32> -> vector<4x8x1xf32>
    %174 = vector.broadcast %173 : vector<4x8x1xf32> to vector<4x8x8xf32>
    %175 = arith.mulf %172, %174 : vector<4x8x8xf32>
    %176 = tpu.transpose %175, [1, 0, 2] : vector<4x8x8xf32> -> vector<8x4x8xf32>
    %177 = vector.shape_cast %176 : vector<8x4x8xf32> to vector<8x32xf32>
    %178 = arith.truncf %177 : vector<8x32xf32> to vector<8x32xbf16>
    %c1_65 = arith.constant 1 : index
    %c0_66 = arith.constant 0 : index
    %c0_67 = arith.constant 0 : index
    %179 = vector.load %arg7[%c1_65, %c0_66, %c0_67] : memref<2x32x32xbf16, #tpu.memory_space<vmem>>, vector<1x32x32xbf16>
    %180 = vector.shape_cast %179 : vector<1x32x32xbf16> to vector<32x32xbf16>
    %cst_68 = arith.constant dense<0.000000e+00> : vector<8x32xf32>
    %181 = tpu.matmul %178, %180, %cst_68 {dimension_numbers = #tpu.dot_dimension_numbers<[1], [0], [0], [1], [0, 0, 1, 1], [], []>} : vector<8x32xbf16>, vector<32x32xbf16>, vector<8x32xf32> -> vector<8x32xf32>
    %182 = vector.broadcast %134 : vector<1x32xf32> to vector<8x32xf32>
    %183 = arith.addf %181, %182 : vector<8x32xf32>
    %184 = arith.addf %131, %183 : vector<8x32xf32>
    %cst_69 = arith.constant dense<0.000000e+00> : vector<8xf32>
    %185 = vector.multi_reduction <add>, %184, %cst_69 [1] : vector<8x32xf32> to vector<8xf32>
    %186 = vector.shape_cast %185 : vector<8xf32> to vector<8x1xf32>
    %cst_70 = arith.constant 3.200000e+01 : f32
    %187 = vector.broadcast %cst_70 : f32 to vector<8x1xf32>
    %188 = arith.divf %186, %187 : vector<8x1xf32>
    %189 = vector.broadcast %188 : vector<8x1xf32> to vector<8x32xf32>
    %190 = arith.subf %184, %189 : vector<8x32xf32>
    %191 = arith.mulf %190, %190 : vector<8x32xf32>
    %cst_71 = arith.constant dense<0.000000e+00> : vector<8xf32>
    %192 = vector.multi_reduction <add>, %191, %cst_71 [1] : vector<8x32xf32> to vector<8xf32>
    %193 = vector.shape_cast %192 : vector<8xf32> to vector<8x1xf32>
    %cst_72 = arith.constant 3.200000e+01 : f32
    %194 = vector.broadcast %cst_72 : f32 to vector<8x1xf32>
    %195 = arith.divf %193, %194 : vector<8x1xf32>
    %196 = vector.broadcast %188 : vector<8x1xf32> to vector<8x32xf32>
    %197 = arith.subf %184, %196 : vector<8x32xf32>
    %cst_73 = arith.constant 9.99999974E-6 : f32
    %198 = vector.broadcast %cst_73 : f32 to vector<8x1xf32>
    %199 = arith.addf %195, %198 : vector<8x1xf32>
    %200 = math.rsqrt %199 : vector<8x1xf32>
    %201 = vector.broadcast %200 : vector<8x1xf32> to vector<8x32xf32>
    %202 = arith.mulf %197, %201 : vector<8x32xf32>
    %203 = vector.broadcast %135 : vector<1x32xf32> to vector<8x32xf32>
    %204 = arith.mulf %202, %203 : vector<8x32xf32>
    %205 = vector.broadcast %136 : vector<1x32xf32> to vector<8x32xf32>
    %206 = arith.addf %204, %205 : vector<8x32xf32>
    %207 = arith.truncf %206 : vector<8x32xf32> to vector<8x32xbf16>
    %c1_74 = arith.constant 1 : index
    %c0_75 = arith.constant 0 : index
    %c0_76 = arith.constant 0 : index
    %208 = vector.load %arg8[%c1_74, %c0_75, %c0_76] : memref<2x32x64xbf16, #tpu.memory_space<vmem>>, vector<1x32x64xbf16>
    %209 = vector.shape_cast %208 : vector<1x32x64xbf16> to vector<32x64xbf16>
    %cst_77 = arith.constant dense<0.000000e+00> : vector<8x64xf32>
    %210 = tpu.matmul %207, %209, %cst_77 {dimension_numbers = #tpu.dot_dimension_numbers<[1], [0], [0], [1], [0, 0, 1, 1], [], []>} : vector<8x32xbf16>, vector<32x64xbf16>, vector<8x64xf32> -> vector<8x64xf32>
    %c1_78 = arith.constant 1 : index
    %c0_79 = arith.constant 0 : index
    %c0_80 = arith.constant 0 : index
    %211 = vector.load %arg9[%c1_78, %c0_79, %c0_80] : memref<2x1x64xf32, #tpu.memory_space<vmem>>, vector<1x1x64xf32>
    %212 = vector.shape_cast %211 : vector<1x1x64xf32> to vector<1x64xf32>
    %213 = vector.broadcast %212 : vector<1x64xf32> to vector<8x64xf32>
    %214 = arith.addf %210, %213 : vector<8x64xf32>
    %cst_81 = arith.constant 0.000000e+00 : f32
    %215 = vector.broadcast %cst_81 : f32 to vector<8x64xf32>
    %216 = arith.maximumf %214, %215 : vector<8x64xf32>
    %217 = arith.truncf %216 : vector<8x64xf32> to vector<8x64xbf16>
    %c1_82 = arith.constant 1 : index
    %c0_83 = arith.constant 0 : index
    %c0_84 = arith.constant 0 : index
    %218 = vector.load %arg10[%c1_82, %c0_83, %c0_84] : memref<2x64x32xbf16, #tpu.memory_space<vmem>>, vector<1x64x32xbf16>
    %219 = vector.shape_cast %218 : vector<1x64x32xbf16> to vector<64x32xbf16>
    %cst_85 = arith.constant dense<0.000000e+00> : vector<8x32xf32>
    %220 = tpu.matmul %217, %219, %cst_85 {dimension_numbers = #tpu.dot_dimension_numbers<[1], [0], [0], [1], [0, 0, 1, 1], [], []>} : vector<8x64xbf16>, vector<64x32xbf16>, vector<8x32xf32> -> vector<8x32xf32>
    %221 = vector.broadcast %137 : vector<1x32xf32> to vector<8x32xf32>
    %222 = arith.addf %220, %221 : vector<8x32xf32>
    %223 = arith.addf %206, %222 : vector<8x32xf32>
    %cst_86 = arith.constant dense<0.000000e+00> : vector<8xf32>
    %224 = vector.multi_reduction <add>, %223, %cst_86 [1] : vector<8x32xf32> to vector<8xf32>
    %225 = vector.shape_cast %224 : vector<8xf32> to vector<8x1xf32>
    %cst_87 = arith.constant 3.200000e+01 : f32
    %226 = vector.broadcast %cst_87 : f32 to vector<8x1xf32>
    %227 = arith.divf %225, %226 : vector<8x1xf32>
    %228 = vector.broadcast %227 : vector<8x1xf32> to vector<8x32xf32>
    %229 = arith.subf %223, %228 : vector<8x32xf32>
    %230 = arith.mulf %229, %229 : vector<8x32xf32>
    %cst_88 = arith.constant dense<0.000000e+00> : vector<8xf32>
    %231 = vector.multi_reduction <add>, %230, %cst_88 [1] : vector<8x32xf32> to vector<8xf32>
    %232 = vector.shape_cast %231 : vector<8xf32> to vector<8x1xf32>
    %cst_89 = arith.constant 3.200000e+01 : f32
    %233 = vector.broadcast %cst_89 : f32 to vector<8x1xf32>
    %234 = arith.divf %232, %233 : vector<8x1xf32>
    %235 = vector.broadcast %227 : vector<8x1xf32> to vector<8x32xf32>
    %236 = arith.subf %223, %235 : vector<8x32xf32>
    %cst_90 = arith.constant 9.99999974E-6 : f32
    %237 = vector.broadcast %cst_90 : f32 to vector<8x1xf32>
    %238 = arith.addf %234, %237 : vector<8x1xf32>
    %239 = math.rsqrt %238 : vector<8x1xf32>
    %240 = vector.broadcast %239 : vector<8x1xf32> to vector<8x32xf32>
    %241 = arith.mulf %236, %240 : vector<8x32xf32>
    %242 = vector.broadcast %138 : vector<1x32xf32> to vector<8x32xf32>
    %243 = arith.mulf %241, %242 : vector<8x32xf32>
    %244 = vector.broadcast %139 : vector<1x32xf32> to vector<8x32xf32>
    %245 = arith.addf %243, %244 : vector<8x32xf32>
    %246 = arith.truncf %245 : vector<8x32xf32> to vector<8x32xbf16>
    %c0_91 = arith.constant 0 : index
    %c0_92 = arith.constant 0 : index
    %247 = vector.load %arg4[%c0_91, %c0_92] : memref<32x128xbf16, #tpu.memory_space<vmem>>, vector<32x128xbf16>
    %cst_93 = arith.constant dense<0.000000e+00> : vector<8x128xf32>
    %248 = tpu.matmul %246, %247, %cst_93 {dimension_numbers = #tpu.dot_dimension_numbers<[1], [0], [0], [1], [0, 0, 1, 1], [], []>} : vector<8x32xbf16>, vector<32x128xbf16>, vector<8x128xf32> -> vector<8x128xf32>
    %c0_94 = arith.constant 0 : index
    %c0_95 = arith.constant 0 : index
    %c0_96 = arith.constant 0 : index
    %249 = vector.load %arg12[%c0_94, %c0_95, %c0_96] : memref<1x8x128xf32, #tpu.memory_space<vmem>>, vector<1x8x128xf32>
    %250 = vector.shape_cast %249 : vector<1x8x128xf32> to vector<8x128xf32>
    %251 = vector.shape_cast %248 : vector<8x128xf32> to vector<1x8x128xf32>
    tpu.vector_store %arg12[%c0_94, %c0_95, %c0_96], %251 {strides = array<i32>} : memref<1x8x128xf32, #tpu.memory_space<vmem>>, vector<1x8x128xf32>,
    return
  }
  func.func @transform_0(%arg0: i32) -> (i32, i32, i32) {
    %c0_i32 = arith.constant 0 : i32
    %c0_i32_0 = arith.constant 0 : i32
    %c0_i32_1 = arith.constant 0 : i32
    return %arg0, %c0_i32, %c0_i32_0 : i32, i32, i32
  }
  func.func @transform_1(%arg0: i32) -> (i32, i32, i32) {
    %c0_i32 = arith.constant 0 : i32
    %c0_i32_0 = arith.constant 0 : i32
    %c0_i32_1 = arith.constant 0 : i32
    return %arg0, %c0_i32, %c0_i32_0 : i32, i32, i32
  }
  func.func @transform_2(%arg0: i32) -> (i32, i32) {
    %c0_i32 = arith.constant 0 : i32
    %c0_i32_0 = arith.constant 0 : i32
    %c0_i32_1 = arith.constant 0 : i32
    return %c0_i32, %c0_i32_0 : i32, i32
  }
  func.func @transform_3(%arg0: i32) -> (i32, i32) {
    %c0_i32 = arith.constant 0 : i32
    %c0_i32_0 = arith.constant 0 : i32
    %c0_i32_1 = arith.constant 0 : i32
    return %c0_i32, %c0_i32_0 : i32, i32
  }
  func.func @transform_4(%arg0: i32) -> (i32, i32, i32) {
    %c0_i32 = arith.constant 0 : i32
    %c0_i32_0 = arith.constant 0 : i32
    %c0_i32_1 = arith.constant 0 : i32
    %c0_i32_2 = arith.constant 0 : i32
    return %c0_i32, %c0_i32_0, %c0_i32_1 : i32, i32, i32
  }
  func.func @transform_5(%arg0: i32) -> (i32, i32, i32) {
    %c0_i32 = arith.constant 0 : i32
    %c0_i32_0 = arith.constant 0 : i32
    %c0_i32_1 = arith.constant 0 : i32
    %c0_i32_2 = arith.constant 0 : i32
    return %c0_i32, %c0_i32_0, %c0_i32_1 : i32, i32, i32
  }
  func.func @transform_6(%arg0: i32) -> (i32, i32, i32) {
    %c0_i32 = arith.constant 0 : i32
    %c0_i32_0 = arith.constant 0 : i32
    %c0_i32_1 = arith.constant 0 : i32
    %c0_i32_2 = arith.constant 0 : i32
    return %c0_i32, %c0_i32_0, %c0_i32_1 : i32, i32, i32
  }
  func.func @transform_7(%arg0: i32) -> (i32, i32, i32) {
    %c0_i32 = arith.constant 0 : i32
    %c0_i32_0 = arith.constant 0 : i32
    %c0_i32_1 = arith.constant 0 : i32
    %c0_i32_2 = arith.constant 0 : i32
    return %c0_i32, %c0_i32_0, %c0_i32_1 : i32, i32, i32
  }
  func.func @transform_8(%arg0: i32) -> (i32, i32, i32) {
    %c0_i32 = arith.constant 0 : i32
    %c0_i32_0 = arith.constant 0 : i32
    %c0_i32_1 = arith.constant 0 : i32
    %c0_i32_2 = arith.constant 0 : i32
    return %c0_i32, %c0_i32_0, %c0_i32_1 : i32, i32, i32
  }
  func.func @transform_9(%arg0: i32) -> (i32, i32, i32) {
    %c0_i32 = arith.constant 0 : i32
    %c0_i32_0 = arith.constant 0 : i32
    %c0_i32_1 = arith.constant 0 : i32
    %c0_i32_2 = arith.constant 0 : i32
    return %c0_i32, %c0_i32_0, %c0_i32_1 : i32, i32, i32
  }
  func.func @transform_10(%arg0: i32) -> (i32, i32, i32) {
    %c0_i32 = arith.constant 0 : i32
    %c0_i32_0 = arith.constant 0 : i32
    %c0_i32_1 = arith.constant 0 : i32
    %c0_i32_2 = arith.constant 0 : i32
    return %c0_i32, %c0_i32_0, %c0_i32_1 : i32, i32, i32
  }
  func.func @transform_11(%arg0: i32) -> (i32, i32, i32) {
    %c0_i32 = arith.constant 0 : i32
    %c0_i32_0 = arith.constant 0 : i32
    %c0_i32_1 = arith.constant 0 : i32
    return %arg0, %c0_i32, %c0_i32_0 : i32, i32, i32
  }
}

</mosaic_0001>

<bundles_post_ra>
// kernel: graph_paraff_encoder_decoder.1
= control target key start
LH: loop header
LB: loop body
LE: loop exit
PB: predicated region body
PF: predicated region fallthrough
CT: control target
= control target key end

     0   :  { %s4737_s0 = inlined_call_operand.vmem [shape: s32[2,8,1], index: 0, kind: input, shape index: {}]   ;;  %s4738_s1 = inlined_call_operand.vmem [shape: f32[2,8,32], index: 1, kind: input, shape index: {}]   ;;  %s4739_s2 = inlined_call_operand.vmem [shape: bf16[128,32], index: 2, kind: input, shape index: {}]   ;;  %s4740_s3 = inlined_call_operand.vmem [shape: bf16[32,128], index: 3, kind: input, shape index: {}]   ;;  %s4741_s4 = inlined_call_operand.vmem [shape: bf16[2,32,96], index: 4, kind: input, shape index: {}]   ;;  %s4742_s5 = inlined_call_operand.vmem [shape: f32[2,1,96], index: 5, kind: input, shape index: {}]   ;;  %s4743_s6 = inlined_call_operand.vmem [shape: bf16[2,32,32], index: 6, kind: input, shape index: {}]   ;;  %s4744_s7 = inlined_call_operand.vmem [shape: bf16[2,32,64], index: 7, kind: input, shape index: {}]   ;;  %s4745_s8 = inlined_call_operand.vmem [shape: f32[2,1,64], index: 8, kind: input, shape index: {}]   ;;  %s4746_s9 = inlined_call_operand.vmem [shape: bf16[2,64,32], index: 9, kind: input, shape index: {}]   ;;  %s4747_s10 = inlined_call_operand.vmem [shape: f32[2,6,32], index: 10, kind: input, shape index: {}]   ;;  %s4748_s11 = inlined_call_operand.hbm [shape: f32[2,8,128], index: 11, kind: output, shape index: {}]  }
   0x1   :  { %4761 = sst [smem:[#allocation5_spill]] %s4737_s0 }
   0x2   :  { %16 = vsyncpa [#allocation3], 0 }
   0x3   :  { %18 = vsyncpa [#allocation3 + $0x1], 0  ;;  %s4059_s17 = smov 0   ;;  %s4061_s18 = smov 0  }
   0x4   :  { %s4063_s19 = smov 0   ;;  %s4065_s20 = smov 0  }
   0x5 LB: > { %s4080_s21 = sadd.s32 4294967295, %s3976_s20   ;;  %s3396_s22 = sadd.s32 4294967294, %s3976_s20   ;;  %s3976_s20 = sphi %s4065_s20, %s4782_s20   ;;  %s3972_s19 = sphi %s4063_s19, %s4781_s19   ;;  %s3968_s18 = sphi %s4061_s18, %s4780_s18   ;;  %s3964_s17 = sphi %s4059_s17, %s4779_s17  }
   0x6   : > { %s4084_s23 = sadd.s32 1, %s3976_s20   ;;  %s272_s24 = sadd.s32 1, %s3972_s19 }
   0x7   : > { %s269_s25 = ssub.s32 %s3976_s20, %s4084_s23  ;;  %p282_p0 = scmp.ne.s32.totalorder %s3972_s19, %s3968_s18 }
   0x8   : > { %p270_p1 = scmp.eq.s32.totalorder %s269_s25, 0  ;;  %p283_p2 = scmp.eq.s32.totalorder %s4080_s21, 1 }
   0x9   : > { %p288_p3 = scmp.ne.s32.totalorder %s3968_s18, %s3964_s17  ;;  %p289_p4 = scmp.eq.s32.totalorder %s3396_s22, 1 }
   0xa   : > { %s4095_s26 = scalar_select %p270_p1, %s3972_s19, %s272_s24  }
   0xb   : > { %p4097_p5 = por %p283_p2, %p282_p0  ;;  %p4101_p6 = por %p289_p4, %p288_p3 }
   0xc   : > { %p3399_p7 = scmp.ge.s32.totalorder %s3976_s20, 1  ;;  %p348_p8 = scmp.lt.s32.totalorder %s3976_s20, 3 }
   0xe   : > { %p349_p9 = pnand %p3399_p7, %p348_p8 }
   0xf   : > { %p391_p10 = scmp.lt.s32.totalorder (!%p349_p9), %s4080_s21, 1  ;;  %v3844_v0 = vld [vmem:[%s4739_s2] sm:$0xff] (!%p349_p9)   ;;  %v3978_v1 = vmov (!%p349_p9), 0   ;;  %v3979_v2 = vmov (!%p349_p9), 0.0   ;;  %v3845_v3 = vld [vmem:[%s4739_s2 + $0x8] sm:$0xff] (!%p349_p9)   ;;  %s4764_s0 = sld [smem:[#allocation5_spill]] (!%p349_p9)  ;;  %v401_v11 = vlaneseq (!%p349_p9) }
  0x10   : > { %352 = sbr.rel (%p349_p9) target bundleno = 5460 (0x1554), region = 64  ;;  %3843 = vset.pattern.permute.xlu0 (!%p349_p9), %v3978_v1  ;;  %3588 = vmatprep.subr.bf16.mxu0 (!%p349_p9), %v3979_v2  ;;  %v3846_v5 = vld [vmem:[%s4739_s2 + $0x10] sm:$0xff] (!%p349_p9)   ;;  %vm3980_vm0 = vmmov (!%p349_p9), 0   ;;  %v3847_v6 = vld [vmem:[%s4739_s2 + $0x18] sm:$0xff] (!%p349_p9)   ;;  %v3848_v7 = vld [vmem:[%s4739_s2 + $0x20] sm:$0xff] (!%p349_p9)   ;;  %vm545_vm3 = vcmask (!%p349_p9), 261120  }
  0x11   : > { %3589 = vmatpush3.bf16.msra.mxu0 (!%p349_p9), %v3844_v0  ;;  %3608 = vmatprep.subr.bf16.mxu1 (!%p349_p9), %v3979_v2  ;;  %v3849_v8 = vld [vmem:[%s4739_s2 + $0x28] sm:$0xff] (!%p349_p9)   ;;  %v3850_v9 = vld [vmem:[%s4739_s2 + $0x30] sm:$0xff] (!%p349_p9)   ;;  %v3851_v10 = vld [vmem:[%s4739_s2 + $0x38] sm:$0xff] (!%p349_p9)   ;;  %v4155_v12 = vand.u32 (!%p349_p9), 127, %v401_v11  ;;  %v3981_v14 = vmov (!%p349_p9), 1.0|1.0  }
  0x12   : > { %3590 = vmatprep.subr.bf16.mxu0 (!%p349_p9), %v3979_v2  ;;  %3604 = vmatprep.mubr.msk.bf16.mxu0 (!%p349_p9), %vm3980_vm0, %v3979_v2  ;;  %v3852_v15 = vld [vmem:[%s4741_s4] sm:$0xff] (!%p349_p9)   ;;  %v3853_v16 = vld [vmem:[%s4741_s4 + $0x8] sm:$0xff] (!%p349_p9)   ;;  %s3983_s14 = smov (!%p349_p9), 96   ;;  %s4760_s16 = smov (!%p349_p9), 80   ;;  %v3991_v31 = vmov (!%p349_p9), 1983009808  }
  0x13   : > { %3612 = vmatprep.mubr.msk.bf16.mxu1 (!%p349_p9), %vm3980_vm0, %v3979_v2  ;;  %3609 = vmatpush3.bf16.msra.mxu1 (!%p349_p9), %v3852_v15  ;;  %v3414_v25 = vld [vmem:[%s4742_s5] ss:$0 sm:$0xff] (!%p349_p9)  ;;  %s4759_s22 = smov (!%p349_p9), 72   ;;  %s4757_s25 = smov (!%p349_p9), 112   ;;  %v626_v32 = vunpack.c.l.s4 (!%p349_p9), %v3991_v31  ;;  %v3992_v33 = vmov (!%p349_p9), 1934713408  }
  0x14   : > { %3610 = vmatprep.subr.bf16.mxu1 (!%p349_p9), %v3979_v2  ;;  %s4756_s29 = smov (!%p349_p9), 104   ;;  %v690_v34 = vunpack.c.l.s4 (!%p349_p9), %v3992_v33  ;;  %v4203_v35 = vshrl.u32 (!%p349_p9), %v401_v11, 7  ;;  %vm1047_vm4 = vcmask (!%p349_p9), 64512   ;;  %s4750_s13 = smov (!%p349_p9), 48   ;;  %vm1281_vm6 = vcmask (!%p349_p9), 1043456  }
  0x15   : > { %3591 = vmatpush3.bf16.msra.mxu0 (!%p349_p9), %v3845_v3  ;;  %v627_v36 = vunpack.c.0.s8 (!%p349_p9), %v626_v32  ;;  %vm1620_vm7 = vcmask (!%p349_p9), 130048   ;;  %vm1622_vm8 = vcmask (!%p349_p9), 195584   ;;  %vm1818_vm9 = vcmask (!%p349_p9), 523264  }
  0x16   : > { %3592 = vmatprep.subr.bf16.mxu0 (!%p349_p9), %v3979_v2  ;;  %v691_v39 = vunpack.c.0.s8 (!%p349_p9), %v690_v34  ;;  %vm4267_vm5 = vcmp.ge.s32.totalorder (!%p349_p9), %v4203_v35, %v4155_v12 }
  0x17   : > { %s4113_s12 = scalar_select %p391_p10, %s4080_s21, 1  ;;  %3611 = vmatpush3.bf16.msra.mxu1 %v3853_v16  ;;  %v4206_v40 = vsub.s32 %v627_v36, %v4203_v35 }
  0x18   : > { %3616 = vmatprep.subr.bf16.mxu1 %v3979_v2  ;;  %v4209_v47 = vsub.s32 %v691_v39, %v4203_v35 }
  0x19   : > { %s3401_s15 = sshll.u32 %s4113_s12, 3  ;;  %3593 = vmatpush3.bf16.msra.mxu0 %v3846_v5  ;;  %s4749_s12 = smov 56  }
  0x1a   : > { %s394_s24 = scalar_lea.vmem %s4764_s0, %s3401_s15  ;;  %3594 = vmatprep.subr.bf16.mxu0 %v3979_v2  ;;  %s398_s30 = scalar_lea.vmem %s4738_s1, %s3401_s15 }
  0x1b   : > { %v400_v4 = vld [vmem:[%s394_s24] sm:$0xff]  ;;  %s3982_s15 = smov 88   ;;  %s4758_s24 = smov 120  }
  0x1c   : > { %404 = vperm.xlu0 %3843, %v400_v4   ;;  %v515_v17 = vld [vmem:[%s398_s30] sm:$0xff]  ;;  %s4752_s30 = smov 64  }
  0x1d   : > { %3595 = vmatpush3.bf16.msra.mxu0 %v3847_v6 }
  0x1e   : > { %3596 = vmatprep.subr.bf16.mxu0 %v3979_v2 }
  0x21   : > { %3597 = vmatpush3.bf16.msra.mxu0 %v3848_v7 }
  0x22   : > { %3598 = vmatprep.subr.bf16.mxu0 %v3979_v2 }
  0x25   : > { %3599 = vmatpush3.bf16.msra.mxu0 %v3849_v8 }
  0x26   : > { %3600 = vmatprep.subr.bf16.mxu0 %v3979_v2 }
  0x29   : > { %3601 = vmatpush3.bf16.msra.mxu0 %v3850_v9 }
  0x2a   : > { %3602 = vmatprep.subr.bf16.mxu0 %v3979_v2 }
  0x2d   : > { %3603 = vmatpush3.bf16.msra.mxu0 %v3851_v10 }
  0x2e   : > { %3634 = vmatprep.subr.bf16.mxu0 %v3979_v2 }
  0x9b   : > { %v405_v13 = vpop.permute.xlu0 %404 }
  0x9c   : > { %vm406_vm1 = vcmp.eq.s32.totalorder %v4155_v12, %v405_v13 }
  0x9d   : > { %vm3412_vm2 = vmpackc.low %vm406_vm1, %vm406_vm1 }
  0x9e   : > { %3605 = vmatmul.mubr.msk.bf16.vlgmr.msra.gmra.mrb[0].mxu0 %vm3412_vm2, %v3981_v14 }
  0x9f   : > { %3636 = vmatprep.mubr.msk.bf16.mxu0 %vm3980_vm0, %v3979_v2 }
 0x171   : > { %v508_v18 = vpop.f32.mrb[0].mxu0 }
 0x172   : > { %v514_v19 = vmul.f32 5.656854, %v508_v18  ;;  %v3606_v20 = vpop.f32.mrb[1].mxu0 }
 0x173   : > { %v511_v21 = vpop.f32.mrb[2].mxu0 }
 0x174   : > { %v4173_v22 = vadd.f32 %v515_v17, %v514_v19  ;;  %v3607_v23 = vpop.f32.mrb[3].mxu0 }
 0x176   : > { %v521_v24 = vpack.c.bf16 %v4173_v22, %v4173_v22 }
 0x178   : > { %3613 = vmatmul.mubr.msk.bf16.vlgmr.msra.gmra.mrb[0].mxu1 %vm545_vm3, %v521_v24 }
 0x179   : > { %3618 = vmatprep.mubr.msk.bf16.mxu1 %vm3980_vm0, %v3979_v2 }
 0x24b   : > { %v583_v26 = vpop.f32.mrb[0].mxu1 }
 0x24c   : > { %v4183_v27 = vadd.f32 %v3414_v25, %v583_v26  ;;  %v3614_v28 = vpop.f32.mrb[1].mxu1 }
 0x24d   : > { %v586_v29 = vpop.f32.mrb[2].mxu1 }
 0x24e   : > { %602 = vrot.lane.b32.xlu1 %v4183_v27, %s3982_s15  ;;  %599 = vrot.lane.b32.xlu0 %v4183_v27, %s3983_s14  ;;  %v3615_v30 = vpop.f32.mrb[3].mxu1 }
 0x252   : > { %605 = vrot.lane.b32.xlu1 %v4183_v27, %s4760_s16  ;;  %608 = vrot.lane.b32.xlu0 %v4183_v27, %s4759_s22  ;;  %s4771_s16 = smov 104   ;;  %s4774_s22 = smov 40  }
 0x256   : > { %590 = vrot.lane.b32.xlu1 %v4183_v27, %s4758_s24  ;;  %593 = vrot.lane.b32.xlu0 %v4183_v27, %s4757_s25  ;;  %s4775_s24 = smov 48  }
 0x25a   : > { %596 = vrot.lane.b32.xlu1 %v4183_v27, %s4756_s29  ;;  %611 = vrot.lane.b32.xlu0 %v4183_v27, %s4752_s30  ;;  %s4753_s30 = smov 24   ;;  %s4767_s29 = smov 80  }
 0x25e   : > { %614 = vrot.lane.b32.xlu1 %v4183_v27, %s4749_s12  ;;  %s4751_s12 = smov 40  }
 0x2c0   : > { %v603_v37 = vpop.permute.xlu1 %602  ;;  %v600_v38 = vpop.permute.xlu0 %599 }
 0x2c4   : > { %v606_v41 = vpop.permute.xlu1 %605  ;;  %v609_v42 = vpop.permute.xlu0 %608 }
 0x2c5   : > { %v655_v43 = vcombine.low %v600_v38, %v606_v41  ;;  %v656_v44 = vcombine.high %v600_v38, %v606_v41  ;;  %v671_v45 = vcombine.low %v603_v37, %v609_v42  ;;  %v672_v46 = vcombine.high %v603_v37, %v609_v42 }
 0x2c7   : > { %v663_v48 = vrot.slane %v655_v43, %v4206_v40  ;;  %v670_v49 = vrot.slane %v656_v44, %v4206_v40  ;;  %v679_v50 = vrot.slane %v671_v45, %v4206_v40  ;;  %v686_v51 = vrot.slane %v672_v46, %v4206_v40 }
 0x2c8   : > { %v591_v52 = vpop.permute.xlu1 %590  ;;  %v594_v57 = vpop.permute.xlu0 %593 }
 0x2c9   : > { %v719_v53 = vcombine.low %v663_v48, %v679_v50  ;;  %v720_v54 = vcombine.high %v663_v48, %v679_v50  ;;  %v735_v55 = vcombine.low %v670_v49, %v686_v51  ;;  %v736_v56 = vcombine.high %v670_v49, %v686_v51 }
 0x2ca   : > { %v623_v62 = vcombine.low %v4183_v27, %v594_v57  ;;  %v624_v63 = vcombine.high %v4183_v27, %v594_v57 }
 0x2cb   : > { %v727_v58 = vrot.slane %v719_v53, %v4209_v47  ;;  %v734_v59 = vrot.slane %v720_v54, %v4209_v47  ;;  %v743_v60 = vrot.slane %v735_v55, %v4209_v47  ;;  %v750_v61 = vrot.slane %v736_v56, %v4209_v47 }
 0x2cc   : > { %v597_v0 = vpop.permute.xlu1 %596  ;;  %v631_v13 = vrot.slane %v623_v62, %v4206_v40  ;;  %v638_v14 = vrot.slane %v624_v63, %v4206_v40 }
 0x2cd   : > { %v3419_v1 = vcombine.low %v727_v58, %v734_v59  ;;  %v3421_v3 = vcombine.high %v727_v58, %v734_v59  ;;  %v3423_v4 = vcombine.low %v743_v60, %v750_v61  ;;  %v3425_v5 = vcombine.high %v743_v60, %v750_v61 }
 0x2ce   : > { %v639_v6 = vcombine.low %v591_v52, %v597_v0  ;;  %v640_v7 = vcombine.high %v591_v52, %v597_v0 }
 0x2cf   : > { %v842_v8 = vrot.slane %v3419_v1, %v4206_v40  ;;  %v858_v9 = vrot.slane %v3421_v3, %v4206_v40  ;;  %v874_v10 = vrot.slane %v3423_v4, %v4206_v40  ;;  %v890_v11 = vrot.slane %v3425_v5, %v4206_v40 }
 0x2d0   : > { %v647_v15 = vrot.slane %v639_v6, %v4206_v40  ;;  %v654_v16 = vrot.slane %v640_v7, %v4206_v40 }
 0x2d1   : > { %v907_v17 = vcombine.low %v842_v8, %v858_v9  ;;  %v939_v18 = vcombine.low %v874_v10, %v890_v11  ;;  %v908_v19 = vcombine.high %v842_v8, %v858_v9  ;;  %v940_v20 = vcombine.high %v874_v10, %v890_v11 }
 0x2d2   : > { %v687_v21 = vcombine.low %v631_v13, %v647_v15  ;;  %v688_v23 = vcombine.high %v631_v13, %v647_v15  ;;  %v703_v24 = vcombine.low %v638_v14, %v654_v16  ;;  %v704_v25 = vcombine.high %v638_v14, %v654_v16 }
 0x2d3   : > { %v915_v26 = vrot.slane %v907_v17, %v4209_v47  ;;  %v947_v28 = vrot.slane %v939_v18, %v4209_v47  ;;  %v922_v29 = vrot.slane %v908_v19, %v4209_v47  ;;  %v954_v30 = vrot.slane %v940_v20, %v4209_v47 }
 0x2d4   : > { %v695_v31 = vrot.slane %v687_v21, %v4209_v47  ;;  %v702_v32 = vrot.slane %v688_v23, %v4209_v47  ;;  %v711_v33 = vrot.slane %v703_v24, %v4209_v47  ;;  %v718_v34 = vrot.slane %v704_v25, %v4209_v47 }
 0x2d5   : > { %v959_v36 = vcombine.low %v915_v26, %v947_v28  ;;  %v962_v37 = vcombine.high %v922_v29, %v954_v30  ;;  %v960_v56 = vcombine.high %v915_v26, %v947_v28  ;;  %v961_v7 = vcombine.low %v922_v29, %v954_v30 }
 0x2d6   : > { %v3418_v38 = vcombine.low %v695_v31, %v702_v32  ;;  %v3420_v39 = vcombine.high %v695_v31, %v702_v32  ;;  %v3422_v41 = vcombine.low %v711_v33, %v718_v34  ;;  %v3424_v42 = vcombine.high %v711_v33, %v718_v34 }
 0x2d7   : > { %v1039_v43 = vpack.c.bf16 %v959_v36, %v959_v36  ;;  %v1042_v44 = vpack.c.bf16 %v962_v37, %v962_v37  ;;  %v1040_v0 = vpack.c.bf16 %v960_v56, %v960_v56  ;;  %v1041_v9 = vpack.c.bf16 %v961_v7, %v961_v7 }
 0x2d8   : > { %v835_v45 = vrot.slane %v3418_v38, %v4206_v40  ;;  %v851_v46 = vrot.slane %v3420_v39, %v4206_v40  ;;  %v867_v48 = vrot.slane %v3422_v41, %v4206_v40  ;;  %v883_v49 = vrot.slane %v3424_v42, %v4206_v40 }
 0x2d9   : > { %v1052_v50 = vsel %vm1047_vm4, %v1039_v43, 0  ;;  %v1190_v51 = vsel %vm1047_vm4, %v1042_v44, 0  ;;  %v1098_v6 = vsel %vm1047_vm4, %v1040_v0, 0  ;;  %v1144_v13 = vsel %vm1047_vm4, %v1041_v9, 0  ;;  %v612_v44 = vpop.permute.xlu0 %611 }
 0x2da   : > { %v891_v52 = vcombine.low %v835_v45, %v851_v46  ;;  %v892_v53 = vcombine.high %v835_v45, %v851_v46  ;;  %v923_v54 = vcombine.low %v867_v48, %v883_v49  ;;  %v924_v55 = vcombine.high %v867_v48, %v883_v49  ;;  %3617 = vmatpush3.bf16.xpose.msra.mxu1 %v1052_v50  ;;  %v615_v48 = vpop.permute.xlu1 %614 }
 0x2db   : > { %3635 = vmatpush3.bf16.xpose.msra.mxu0 %v1190_v51  ;;  %3622 = vmatprep.subr.bf16.mxu1 %v3979_v2 }
 0x2dc   : > { %v899_v57 = vrot.slane %v891_v52, %v4209_v47  ;;  %v931_v58 = vrot.slane %v923_v54, %v4209_v47  ;;  %v906_v59 = vrot.slane %v892_v53, %v4209_v47  ;;  %v938_v60 = vrot.slane %v924_v55, %v4209_v47  ;;  %3646 = vmatprep.subr.bf16.mxu0 %v3979_v2 }
 0x2de   : > { %v955_v61 = vcombine.low %v899_v57, %v931_v58  ;;  %v958_v62 = vcombine.high %v906_v59, %v938_v60  ;;  %v956_v5 = vcombine.high %v899_v57, %v931_v58  ;;  %v957_v11 = vcombine.low %v906_v59, %v938_v60 }
 0x2e0   : > { %v1031_v63 = vmul.f32 0.35355338, %v955_v61  ;;  %v1034_v1 = vmul.f32 0.35355338, %v958_v62  ;;  %v1032_v8 = vmul.f32 0.35355338, %v956_v5 }
 0x2e1   : > { %v1033_v14 = vmul.f32 0.35355338, %v957_v11 }
 0x2e2   : > { %v1035_v3 = vpack.c.bf16 %v1031_v63, %v1031_v63  ;;  %v1038_v4 = vpack.c.bf16 %v1034_v1, %v1034_v1  ;;  %v1036_v10 = vpack.c.bf16 %v1032_v8, %v1032_v8 }
 0x2e3   : > { %v1037_v15 = vpack.c.bf16 %v1033_v14, %v1033_v14 }
 0x2e4   : > { %3619 = vmatmul.mubr.msk.bf16.vlgmr.msra.gmra.mrb[4].mxu1 %vm1047_vm4, %v1035_v3  ;;  %3637 = vmatmul.mubr.msk.bf16.vlgmr.msra.gmra.mrb[4].mxu0 %vm1047_vm4, %v1038_v4 }
 0x2e5   : > { %3623 = vmatpush3.bf16.xpose.msra.mxu1 %v1098_v6  ;;  %3624 = vmatprep.mubr.msk.bf16.mxu1 %vm3980_vm0, %v3979_v2 }
 0x2e6   : > { %3628 = vmatprep.subr.bf16.mxu1 %v3979_v2  ;;  %3648 = vmatprep.mubr.msk.bf16.mxu0 %vm3980_vm0, %v3979_v2 }
 0x2ec   : > { %3625 = vmatmul.mubr.msk.bf16.vlgmr.msra.gmra.mrb[8].mxu1 %vm1047_vm4, %v1036_v10 }
 0x2ed   : > { %3629 = vmatpush3.bf16.xpose.msra.mxu1 %v1144_v13  ;;  %3630 = vmatprep.mubr.msk.bf16.mxu1 %vm3980_vm0, %v3979_v2 }
 0x2ee   : > { %3640 = vmatprep.subr.bf16.mxu1 %v3979_v2 }
 0x2f4   : > { %3631 = vmatmul.mubr.msk.bf16.vlgmr.msra.gmra.mrb[12].mxu1 %vm1047_vm4, %v1037_v15 }
 0x2f5   : > { %3642 = vmatprep.mubr.msk.bf16.mxu1 %vm3980_vm0, %v3979_v2 }
 0x3b7   : > { %v1088_v17 = vpop.f32.mrb[4].mxu1  ;;  %v1226_v18 = vpop.f32.mrb[4].mxu0 }
 0x3b8   : > { %v1234_v19 = vsel %vm4267_vm5, %v1088_v17, -1e+09  ;;  %v3620_v20 = vpop.f32.mrb[5].mxu1  ;;  %v3638_v21 = vpop.f32.mrb[5].mxu0  ;;  %v4289_v42 = vsel %vm4267_vm5, %v1226_v18, -1e+09 }
 0x3b9   : > { %v1091_v23 = vpop.f32.mrb[6].mxu1  ;;  %v1229_v24 = vpop.f32.mrb[6].mxu0  ;;  %v1238_v25 = vsel %vm1047_vm4, %v1234_v19, -inf  ;;  %v1247_v43 = vsel %vm1047_vm4, %v4289_v42, -inf }
 0x3ba   : > { %1239 = vmax.xlane.f32.xlu0 %v1238_v25  ;;  %v3621_v26 = vpop.f32.mrb[7].mxu1  ;;  %v3639_v28 = vpop.f32.mrb[7].mxu0 }
 0x3bf   : > { %v1134_v29 = vpop.f32.mrb[8].mxu1 }
 0x3c0   : > { %v1235_v12 = vsel %vm4267_vm5, %v1134_v29, -1e+09  ;;  %v3626_v30 = vpop.f32.mrb[9].mxu1 }
 0x3c1   : > { %v1137_v31 = vpop.f32.mrb[10].mxu1  ;;  %v1241_v32 = vsel %vm1047_vm4, %v1235_v12, -inf }
 0x3c2   : > { %1242 = vmax.xlane.f32.xlu1 %v1241_v32  ;;  %v3627_v33 = vpop.f32.mrb[11].mxu1 }
 0x3c7   : > { %v1180_v34 = vpop.f32.mrb[12].mxu1 }
 0x3c8   : > { %v3632_v36 = vpop.f32.mrb[13].mxu1  ;;  %v4283_v39 = vsel %vm4267_vm5, %v1180_v34, -1e+09 }
 0x3c9   : > { %v1183_v37 = vpop.f32.mrb[14].mxu1  ;;  %v1244_v41 = vsel %vm1047_vm4, %v4283_v39, -inf }
 0x3ca   : > { %v3633_v38 = vpop.f32.mrb[15].mxu1 }
 0x3d0   : > { %617 = vrot.lane.b32.xlu0 %v4183_v27, %s4750_s13  ;;  %s4754_s13 = smov 8  }
 0x3d3   : > { %620 = vrot.lane.b32.xlu1 %v4183_v27, %s4751_s12  ;;  %s4755_s12 = smov 16  }
 0x3ef   : > { %1245 = vmax.xlane.f32.xlu0 %v1244_v41 }
 0x3f7   : > { %1248 = vmax.xlane.f32.xlu1 %v1247_v43 }
 0x447   : > { %v1240_v45 = vpop.xlane.xlu0 %1239 }
 0x448   : > { %v1250_v46 = vsub.f32 %v1234_v19, %v1240_v45 }
 0x44a   : > { %v1254_v27 = vmul.f32 1.442695, %v1250_v46 }
 0x44b   : > { %v618_v49 = vpop.permute.xlu0 %617 }
 0x44c   : > { %3874 = vpow2.f32 %v1254_v27  ;;  %v759_v52 = vcombine.low %v612_v44, %v618_v49  ;;  %v760_v53 = vcombine.high %v612_v44, %v618_v49 }
 0x44e   : > { %v767_v59 = vrot.slane %v759_v52, %v4206_v40  ;;  %v774_v60 = vrot.slane %v760_v53, %v4206_v40 }
 0x44f   : > { %v1243_v50 = vpop.xlane.xlu1 %1242 }
 0x450   : > { %v1251_v51 = vsub.f32 %v1235_v12, %v1243_v50 }
 0x452   : > { %v1256_v54 = vmul.f32 1.442695, %v1251_v51 }
 0x453   : > { %v621_v55 = vpop.permute.xlu1 %620 }
 0x454   : > { %3876 = vpow2.f32 %v1256_v54  ;;  %v775_v56 = vcombine.low %v615_v48, %v621_v55  ;;  %v776_v57 = vcombine.high %v615_v48, %v621_v55 }
 0x456   : > { %v3875_v58 = vpop.eup %3874  ;;  %v783_v61 = vrot.slane %v775_v56, %v4206_v40  ;;  %v790_v62 = vrot.slane %v776_v57, %v4206_v40 }
 0x457   : > { %v1262_v63 = vsel %vm1047_vm4, %v3875_v58, 0.0  ;;  %v1274_v44 = vpack.c.bf16 %v3875_v58, %v3875_v58 }
 0x458   : > { %v791_v0 = vcombine.low %v767_v59, %v783_v61  ;;  %v792_v1 = vcombine.high %v767_v59, %v783_v61  ;;  %v807_v3 = vcombine.low %v774_v60, %v790_v62  ;;  %v808_v4 = vcombine.high %v774_v60, %v790_v62  ;;  %1263 = vadd.xlane.f32.xlu0 %v1262_v63 }
 0x45a   : > { %v799_v5 = vrot.slane %v791_v0, %v4209_v47  ;;  %v806_v6 = vrot.slane %v792_v1, %v4209_v47  ;;  %v815_v7 = vrot.slane %v807_v3, %v4209_v47  ;;  %v822_v8 = vrot.slane %v808_v4, %v4209_v47 }
 0x45c   : > { %v963_v9 = vcombine.low %v799_v5, %v806_v6  ;;  %v3426_v10 = vcombine.high %v799_v5, %v806_v6  ;;  %v979_v11 = vcombine.low %v815_v7, %v822_v8  ;;  %v3427_v13 = vcombine.high %v815_v7, %v822_v8 }
 0x45e   : > { %v3877_v14 = vpop.eup %3876  ;;  %v970_v15 = vrot.slane %v963_v9, %v4206_v40  ;;  %v978_v17 = vrot.slane %v3426_v10, %v4206_v40  ;;  %v986_v18 = vrot.slane %v979_v11, %v4206_v40  ;;  %v994_v19 = vrot.slane %v3427_v13, %v4206_v40 }
 0x45f   : > { %v1265_v20 = vsel %vm1047_vm4, %v3877_v14, 0.0  ;;  %v1275_v45 = vpack.c.bf16 %v3877_v14, %v3877_v14 }
 0x460   : > { %1266 = vadd.xlane.f32.xlu0 %v1265_v20  ;;  %v995_v21 = vcombine.low %v970_v15, %v978_v17  ;;  %v1011_v23 = vcombine.low %v986_v18, %v994_v19  ;;  %v996_v24 = vcombine.high %v970_v15, %v978_v17  ;;  %v1012_v25 = vcombine.high %v986_v18, %v994_v19 }
 0x462   : > { %v1003_v26 = vrot.slane %v995_v21, %v4209_v47  ;;  %v1019_v28 = vrot.slane %v1011_v23, %v4209_v47  ;;  %v1010_v29 = vrot.slane %v996_v24, %v4209_v47  ;;  %v1026_v12 = vrot.slane %v1012_v25, %v4209_v47 }
 0x464   : > { %v1027_v30 = vcombine.low %v1003_v26, %v1019_v28  ;;  %v1028_v31 = vcombine.high %v1003_v26, %v1019_v28  ;;  %v1029_v32 = vcombine.low %v1010_v29, %v1026_v12  ;;  %v1030_v33 = vcombine.high %v1010_v29, %v1026_v12 }
 0x466   : > { %v1043_v34 = vpack.c.bf16 %v1027_v30, %v1027_v30  ;;  %v1044_v36 = vpack.c.bf16 %v1028_v31, %v1028_v31  ;;  %v1045_v41 = vpack.c.bf16 %v1029_v32, %v1029_v32  ;;  %v1046_v43 = vpack.c.bf16 %v1030_v33, %v1030_v33 }
 0x468   : > { %v1283_v37 = vsel %vm1281_vm6, %v1043_v34, 0  ;;  %v1329_v38 = vsel %vm1281_vm6, %v1044_v36, 0  ;;  %v1375_v46 = vsel %vm1281_vm6, %v1045_v41, 0  ;;  %v1421_v27 = vsel %vm1281_vm6, %v1046_v43, 0  ;;  %v3855_v43 = vld [vmem:[%s4743_s6 + $0x8] sm:$0xff]  }
 0x469   : > { %3641 = vmatpush3.bf16.msra.mxu1 %v1283_v37  ;;  %3647 = vmatpush3.bf16.msra.mxu0 %v1329_v38 }
 0x46a   : > { %3652 = vmatprep.subr.bf16.mxu1 %v3979_v2  ;;  %3658 = vmatprep.subr.bf16.mxu0 %v3979_v2 }
 0x46c   : > { %3643 = vmatmul.mubr.msk.bf16.vlgmr.msra.gmra.mrb[16].mxu1 %vm1047_vm4, %v1274_v44  ;;  %3649 = vmatmul.mubr.msk.bf16.vlgmr.msra.gmra.mrb[8].mxu0 %vm1047_vm4, %v1275_v45 }
 0x46d   : > { %3653 = vmatpush3.bf16.msra.mxu1 %v1375_v46  ;;  %3659 = vmatpush3.bf16.msra.mxu0 %v1421_v27 }
 0x46e   : > { %3654 = vmatprep.mubr.msk.bf16.mxu1 %vm3980_vm0, %v3979_v2  ;;  %3660 = vmatprep.mubr.msk.bf16.mxu0 %vm3980_vm0, %v3979_v2 }
 0x46f   : > { %3664 = vmatprep.subr.bf16.mxu1 %v3979_v2  ;;  %3672 = vmatprep.subr.bf16.mxu0 %v3979_v2 }
 0x47c   : > { %v1246_v48 = vpop.xlane.xlu0 %1245 }
 0x47d   : > { %v1252_v49 = vsub.f32 %v4283_v39, %v1246_v48 }
 0x47f   : > { %v1258_v50 = vmul.f32 1.442695, %v1252_v49 }
 0x481   : > { %3878 = vpow2.f32 %v1258_v50 }
 0x484   : > { %v1249_v51 = vpop.xlane.xlu1 %1248 }
 0x485   : > { %v1253_v52 = vsub.f32 %v4289_v42, %v1249_v51  ;;  %v3854_v42 = vld [vmem:[%s4743_s6] sm:$0xff]  }
 0x487   : > { %v1260_v53 = vmul.f32 1.442695, %v1253_v52 }
 0x489   : > { %3880 = vpow2.f32 %v1260_v53 }
 0x48b   : > { %v3879_v54 = vpop.eup %3878 }
 0x48c   : > { %v1268_v55 = vsel %vm1047_vm4, %v3879_v54, 0.0  ;;  %v1276_v56 = vpack.c.bf16 %v3879_v54, %v3879_v54 }
 0x48d   : > { %1269 = vadd.xlane.f32.xlu1 %v1268_v55 }
 0x48e   : > { %3655 = vmatmul.mubr.msk.bf16.vlgmr.msra.gmra.mrb[20].mxu1 %vm1047_vm4, %v1276_v56 }
 0x48f   : > { %3668 = vmatprep.mubr.msk.bf16.mxu1 %vm3980_vm0, %v3979_v2  ;;  %3665 = vmatpush3.bf16.msra.mxu1 %v3854_v42 }
 0x490   : > { %3666 = vmatprep.subr.bf16.mxu1 %v3979_v2 }
 0x493   : > { %v3881_v57 = vpop.eup %3880  ;;  %3667 = vmatpush3.bf16.msra.mxu1 %v3855_v43 }
 0x494   : > { %v1271_v39 = vsel %vm1047_vm4, %v3881_v57, 0.0  ;;  %v1277_v58 = vpack.c.bf16 %v3881_v57, %v3881_v57  ;;  %3680 = vmatprep.subr.bf16.mxu1 %v3979_v2 }
 0x495   : > { %1272 = vadd.xlane.f32.xlu0 %v1271_v39 }
 0x496   : > { %3661 = vmatmul.mubr.msk.bf16.vlgmr.msra.gmra.mrb[12].mxu0 %vm1047_vm4, %v1277_v58 }
 0x497   : > { %3676 = vmatprep.mubr.msk.bf16.mxu0 %vm3980_vm0, %v3979_v2 }
 0x4e5   : > { %v1264_v4 = vpop.xlane.xlu0 %1263 }
 0x4e6   : > { %3882 = vrcp.f32 %v1264_v4 }
 0x4ed   : > { %v1267_v6 = vpop.xlane.xlu0 %1266 }
 0x4f0   : > { %v3883_v8 = vpop.eup %3882 }
 0x51a   : > { %v1270_v5 = vpop.xlane.xlu1 %1269 }
 0x51b   : > { %3884 = vrcp.f32 %v1270_v5 }
 0x51c   : > { %3886 = vrcp.f32 %v1267_v6 }
 0x522   : > { %v1273_v7 = vpop.xlane.xlu0 %1272 }
 0x523   : > { %3888 = vrcp.f32 %v1273_v7 }
 0x525   : > { %v3885_v9 = vpop.eup %3884 }
 0x526   : > { %v3887_v20 = vpop.eup %3886 }
 0x52d   : > { %v3889_v21 = vpop.eup %3888 }
 0x53f   : > { %v1319_v59 = vpop.f32.mrb[16].mxu1  ;;  %v1365_v60 = vpop.f32.mrb[8].mxu0 }
 0x540   : > { %v3644_v61 = vpop.f32.mrb[17].mxu1  ;;  %v3650_v62 = vpop.f32.mrb[9].mxu0  ;;  %v1467_v11 = vmul.f32 %v3883_v8, %v1319_v59  ;;  %v1468_v24 = vmul.f32 %v3887_v20, %v1365_v60 }
 0x541   : > { %v1322_v63 = vpop.f32.mrb[18].mxu1  ;;  %v1368_v0 = vpop.f32.mrb[10].mxu0 }
 0x542   : > { %v3645_v1 = vpop.f32.mrb[19].mxu1  ;;  %v3651_v3 = vpop.f32.mrb[11].mxu0 }
 0x561   : > { %v1411_v10 = vpop.f32.mrb[20].mxu1 }
 0x562   : > { %v1469_v13 = vmul.f32 %v3885_v9, %v1411_v10  ;;  %v3656_v14 = vpop.f32.mrb[21].mxu1  ;;  %v1631_v10 = vsub.s32 0, %v4203_v35 }
 0x563   : > { %v1414_v15 = vpop.f32.mrb[22].mxu1 }
 0x564   : > { %v1471_v17 = vcombine.low %v1467_v11, %v1469_v13  ;;  %v1472_v18 = vcombine.high %v1467_v11, %v1469_v13  ;;  %v3657_v19 = vpop.f32.mrb[23].mxu1  ;;  %v4372_v11 = vld [vmem:[%s4747_s10] sm:$0x3f] }
 0x565   : > { %v1632_v13 = vrot.slane %v4372_v11, %v1631_v10 }
 0x566   : > { %v1479_v31 = vrot.slane %v1471_v17, %v4206_v40  ;;  %v1486_v32 = vrot.slane %v1472_v18, %v4206_v40 }
 0x569   : > { %v1457_v23 = vpop.f32.mrb[12].mxu0 }
 0x56a   : > { %v1470_v25 = vmul.f32 %v3889_v21, %v1457_v23  ;;  %v3662_v26 = vpop.f32.mrb[13].mxu0 }
 0x56b   : > { %v1460_v28 = vpop.f32.mrb[14].mxu0 }
 0x56c   : > { %v1487_v29 = vcombine.low %v1468_v24, %v1470_v25  ;;  %v1488_v12 = vcombine.high %v1468_v24, %v1470_v25  ;;  %v3663_v30 = vpop.f32.mrb[15].mxu0 }
 0x56d   : > { %v3859_v30 = vld [vmem:[%s4746_s9 + $0x8] sm:$0xff]  }
 0x56e   : > { %v1495_v33 = vrot.slane %v1487_v29, %v4206_v40  ;;  %v1502_v34 = vrot.slane %v1488_v12, %v4206_v40  ;;  %v3856_v29 = vld [vmem:[%s4744_s7] sm:$0xff]   ;;  %v3857_v12 = vld [vmem:[%s4744_s7 + $0x8] sm:$0xff]  }
 0x56f   : > { %3673 = vmatpush3.bf16.msra.mxu0 %v3856_v29 }
 0x570   : > { %v1503_v36 = vcombine.low %v1479_v31, %v1495_v33  ;;  %v1504_v37 = vcombine.high %v1479_v31, %v1495_v33  ;;  %v1519_v38 = vcombine.low %v1486_v32, %v1502_v34  ;;  %v1520_v41 = vcombine.high %v1486_v32, %v1502_v34  ;;  %3674 = vmatprep.subr.bf16.mxu0 %v3979_v2 }
 0x571   : > { %v1705_v34 = vsub.s32 1, %v4203_v35 }
 0x572   : > { %v1511_v44 = vrot.slane %v1503_v36, %v4209_v47  ;;  %v1518_v45 = vrot.slane %v1504_v37, %v4209_v47  ;;  %v1527_v46 = vrot.slane %v1519_v38, %v4209_v47  ;;  %v1534_v27 = vrot.slane %v1520_v41, %v4209_v47 }
 0x573   : > { %3675 = vmatpush3.bf16.msra.mxu0 %v3857_v12  ;;  %v1710_v36 = vsub.s32 2, %v4203_v35  ;;  %v1706_v37 = vrot.slane %v4372_v11, %v1705_v34 }
 0x574   : > { %v1539_v48 = vcombine.low %v1511_v44, %v1518_v45  ;;  %v3436_v49 = vcombine.high %v1511_v44, %v1518_v45  ;;  %v1555_v50 = vcombine.low %v1527_v46, %v1534_v27  ;;  %v3437_v51 = vcombine.high %v1527_v46, %v1534_v27  ;;  %3692 = vmatprep.subr.bf16.mxu0 %v3979_v2  ;;  %v3860_v27 = vld [vmem:[%s4746_s9 + $0x10] sm:$0xff]  }
 0x575   : > { %v1711_v43 = vrot.slane %v4372_v11, %v1710_v36 }
 0x576   : > { %v1546_v52 = vrot.slane %v1539_v48, %v4206_v40  ;;  %v1554_v53 = vrot.slane %v3436_v49, %v4206_v40  ;;  %v1562_v54 = vrot.slane %v1555_v50, %v4206_v40  ;;  %v1570_v55 = vrot.slane %v3437_v51, %v4206_v40  ;;  %v3861_v48 = vld [vmem:[%s4746_s9 + $0x18] sm:$0xff]   ;;  %v3441_v49 = vld [vmem:[%s4745_s8] ss:$0 sm:$0xff] }
 0x578   : > { %v1572_v56 = vcombine.high %v1546_v52, %v1554_v53  ;;  %v1588_v57 = vcombine.high %v1562_v54, %v1570_v55  ;;  %v1571_v39 = vcombine.low %v1546_v52, %v1554_v53  ;;  %v1587_v58 = vcombine.low %v1562_v54, %v1570_v55 }
 0x57a   : > { %v1586_v42 = vrot.slane %v1572_v56, %v4209_v47  ;;  %v1602_v59 = vrot.slane %v1588_v57, %v4209_v47  ;;  %v1579_v60 = vrot.slane %v1571_v39, %v4209_v47  ;;  %v1595_v61 = vrot.slane %v1587_v58, %v4209_v47 }
 0x57b   : > { %v1792_v57 = vsub.s32 3, %v4203_v35 }
 0x57c   : > { %v1605_v62 = vcombine.low %v1586_v42, %v1602_v59  ;;  %v1604_v63 = vcombine.high %v1579_v60, %v1595_v61  ;;  %v1606_v0 = vcombine.high %v1586_v42, %v1602_v59  ;;  %v1603_v1 = vcombine.low %v1579_v60, %v1595_v61 }
 0x57d   : > { %v1793_v39 = vrot.slane %v4372_v11, %v1792_v57 }
 0x57e   : > { %1612 = vrot.lane.b32.xlu0 %v1605_v62, %s4755_s12  ;;  %1608 = vrot.lane.b32.xlu1 %v1604_v63, %s4754_s13  ;;  %s4768_s12 = smov 72   ;;  %s4770_s13 = smov 112  }
 0x582   : > { %1616 = vrot.lane.b32.xlu1 %v1606_v0, %s4753_s30  ;;  %s4769_s30 = smov 120  }
 0x5f0   : > { %v1609_v3 = vpop.permute.xlu1 %1608  ;;  %v1613_v4 = vpop.permute.xlu0 %1612 }
 0x5f1   : > { %v1619_v5 = vsel %vm1047_vm4, %v1603_v1, %v1609_v3 }
 0x5f2   : > { %v1621_v7 = vsel %vm1620_vm7, %v1619_v5, %v1613_v4 }
 0x5f4   : > { %v1617_v6 = vpop.permute.xlu1 %1616 }
 0x5f5   : > { %v1623_v8 = vsel %vm1622_vm8, %v1621_v7, %v1617_v6  ;;  %v3862_v6 = vld [vmem:[%s4741_s4 + $0x10] sm:$0xff]   ;;  %v3863_v7 = vld [vmem:[%s4741_s4 + $0x18] sm:$0xff]  }
 0x5f6   : > { %v1624_v9 = vpack.c.bf16 %v1623_v8, %v1623_v8 }
 0x5f8   : > { %3669 = vmatmul.mubr.msk.bf16.vlgmr.msra.gmra.mrb[24].mxu1 %vm545_vm3, %v1624_v9 }
 0x5f9   : > { %3688 = vmatprep.mubr.msk.bf16.mxu1 %vm3980_vm0, %v3979_v2 }
 0x6cb   : > { %v1682_v14 = vpop.f32.mrb[24].mxu1 }
 0x6cc   : > { %v1683_v15 = vadd.f32 %v1682_v14, %v1632_v13  ;;  %v3670_v17 = vpop.f32.mrb[25].mxu1  ;;  %v1878_v14 = vsub.s32 4, %v4203_v35 }
 0x6cd   : > { %v1685_v18 = vpop.f32.mrb[26].mxu1 }
 0x6ce   : > { %v3671_v19 = vpop.f32.mrb[27].mxu1  ;;  %v1688_v20 = vadd.f32 %v1683_v15, %v4173_v22  ;;  %v3858_v22 = vld [vmem:[%s4746_s9] sm:$0xff]   ;;  %v1883_v15 = vsub.s32 5, %v4203_v35  ;;  %v1879_v17 = vrot.slane %v4372_v11, %v1878_v14 }
 0x6cf   : > { %3681 = vmatpush3.bf16.msra.mxu1 %v3858_v22 }
 0x6d0   : > { %v1689_v21 = vsel %vm545_vm3, %v1688_v20, 0.0  ;;  %3682 = vmatprep.subr.bf16.mxu1 %v3979_v2 }
 0x6d1   : > { %1690 = vadd.xlane.f32.xlu1 %v1689_v21 }
 0x6d3   : > { %3683 = vmatpush3.bf16.msra.mxu1 %v3859_v30 }
 0x6d4   : > { %3684 = vmatprep.subr.bf16.mxu1 %v3979_v2 }
 0x6d7   : > { %3685 = vmatpush3.bf16.msra.mxu1 %v3860_v27 }
 0x6d8   : > { %3686 = vmatprep.subr.bf16.mxu1 %v3979_v2 }
 0x6db   : > { %3687 = vmatpush3.bf16.msra.mxu1 %v3861_v48 }
 0x6dc   : > { %3706 = vmatprep.subr.bf16.mxu1 %v3979_v2 }
 0x75e   : > { %v1691_v23 = vpop.xlane.xlu1 %1690 }
 0x75f   : > { %v1693_v24 = vmul.f32 0.03125, %v1691_v23 }
 0x761   : > { %v1694_v25 = vsub.f32 %v1688_v20, %v1693_v24  ;;  %v1884_v20 = vrot.slane %v4372_v11, %v1883_v15 }
 0x763   : > { %v1695_v26 = vmul.f32 %v1694_v25, %v1694_v25 }
 0x765   : > { %v1696_v28 = vsel %vm545_vm3, %v1695_v26, 0.0 }
 0x766   : > { %1697 = vadd.xlane.f32.xlu0 %v1696_v28 }
 0x7f3   : > { %v1698_v31 = vpop.xlane.xlu0 %1697 }
 0x7f4   : > { %v1699_v32 = vmul.f32 0.03125, %v1698_v31 }
 0x7f6   : > { %v1700_v33 = vadd.f32 1e-05, %v1699_v32 }
 0x7f8   : > { %3890 = vrsqrt.f32 %v1700_v33 }
 0x802   : > { %v3891_v38 = vpop.eup %3890 }
 0x803   : > { %v1702_v41 = vmul.f32 %v3891_v38, %v1694_v25  ;;  %v3456_v25 = vld [vmem:[%s4742_s5 + $0x1] ss:$0 sm:$0xff] }
 0x805   : > { %v1707_v44 = vmul.f32 %v1706_v37, %v1702_v41 }
 0x807   : > { %v1712_v45 = vadd.f32 %v1711_v43, %v1707_v44 }
 0x809   : > { %v1713_v46 = vpack.c.bf16 %v1712_v45, %v1712_v45 }
 0x80b   : > { %3677 = vmatmul.mubr.msk.bf16.vlgmr.msra.gmra.mrb[16].mxu0 %vm545_vm3, %v1713_v46 }
 0x80c   : > { %3696 = vmatprep.mubr.msk.bf16.mxu0 %vm3980_vm0, %v3979_v2  ;;  %3693 = vmatpush3.bf16.msra.mxu0 %v3862_v6 }
 0x80d   : > { %3694 = vmatprep.subr.bf16.mxu0 %v3979_v2 }
 0x810   : > { %3695 = vmatpush3.bf16.msra.mxu0 %v3863_v7 }
 0x811   : > { %3700 = vmatprep.subr.bf16.mxu0 %v3979_v2 }
 0x8de   : > { %v1774_v50 = vpop.f32.mrb[16].mxu0 }
 0x8df   : > { %v1775_v51 = vadd.f32 %v3441_v49, %v1774_v50  ;;  %v3678_v52 = vpop.f32.mrb[17].mxu0 }
 0x8e0   : > { %v1777_v53 = vpop.f32.mrb[18].mxu0 }
 0x8e1   : > { %v1780_v54 = vmax.f32 %v1775_v51, 0.0  ;;  %v3679_v55 = vpop.f32.mrb[19].mxu0 }
 0x8e3   : > { %v1781_v56 = vpack.c.bf16 %v1780_v54, %v1780_v54 }
 0x8e5   : > { %3689 = vmatmul.mubr.msk.bf16.vlgmr.msra.gmra.mrb[28].mxu1 %vm1818_vm9, %v1781_v56 }
 0x8e6   : > { %3708 = vmatprep.mubr.msk.bf16.mxu1 %vm3980_vm0, %v3979_v2 }
 0x9b8   : > { %v1856_v58 = vpop.f32.mrb[28].mxu1 }
 0x9b9   : > { %v1857_v42 = vadd.f32 %v1856_v58, %v1793_v39  ;;  %v3690_v59 = vpop.f32.mrb[29].mxu1 }
 0x9ba   : > { %v1859_v60 = vpop.f32.mrb[30].mxu1 }
 0x9bb   : > { %v3691_v61 = vpop.f32.mrb[31].mxu1  ;;  %v1862_v62 = vadd.f32 %v1857_v42, %v1712_v45 }
 0x9bd   : > { %v1863_v63 = vsel %vm545_vm3, %v1862_v62, 0.0 }
 0x9be   : > { %1864 = vadd.xlane.f32.xlu0 %v1863_v63 }
 0xa4b   : > { %v1865_v0 = vpop.xlane.xlu0 %1864 }
 0xa4c   : > { %v1866_v1 = vmul.f32 0.03125, %v1865_v0 }
 0xa4e   : > { %v1867_v3 = vsub.f32 %v1862_v62, %v1866_v1 }
 0xa50   : > { %v1868_v4 = vmul.f32 %v1867_v3, %v1867_v3 }
 0xa52   : > { %v1869_v5 = vsel %vm545_vm3, %v1868_v4, 0.0 }
 0xa53   : > { %1870 = vadd.xlane.f32.xlu1 %v1869_v5 }
 0xae0   : > { %v1871_v8 = vpop.xlane.xlu1 %1870 }
 0xae1   : > { %v1872_v9 = vmul.f32 0.03125, %v1871_v8 }
 0xae3   : > { %v1873_v13 = vadd.f32 1e-05, %v1872_v9 }
 0xae5   : > { %3892 = vrsqrt.f32 %v1873_v13 }
 0xaef   : > { %v3893_v18 = vpop.eup %3892 }
 0xaf0   : > { %v1875_v19 = vmul.f32 %v3893_v18, %v1867_v3 }
 0xaf2   : > { %v1880_v21 = vmul.f32 %v1879_v17, %v1875_v19 }
 0xaf4   : > { %v4443_v23 = vadd.f32 %v1884_v20, %v1880_v21 }
 0xaf6   : > { %v1888_v24 = vpack.c.bf16 %v4443_v23, %v4443_v23 }
 0xaf8   : > { %3697 = vmatmul.mubr.msk.bf16.vlgmr.msra.gmra.mrb[20].mxu0 %vm545_vm3, %v1888_v24 }
 0xaf9   : > { %3702 = vmatprep.mubr.msk.bf16.mxu0 %vm3980_vm0, %v3979_v2 }
 0xbcb   : > { %v1951_v26 = vpop.f32.mrb[20].mxu0 }
 0xbcc   : > { %v4453_v28 = vadd.f32 %v3456_v25, %v1951_v26  ;;  %v3698_v29 = vpop.f32.mrb[21].mxu0 }
 0xbcd   : > { %v1954_v11 = vpop.f32.mrb[22].mxu0 }
 0xbce   : > { %1970 = vrot.lane.b32.xlu1 %v4453_v28, %s3982_s15  ;;  %1967 = vrot.lane.b32.xlu0 %v4453_v28, %s3983_s14  ;;  %v3699_v12 = vpop.f32.mrb[23].mxu0  ;;  %s4772_s15 = smov 64   ;;  %s4773_s14 = smov 56  }
 0xbd2   : > { %1973 = vrot.lane.b32.xlu1 %v4453_v28, %s4767_s29  ;;  %1976 = vrot.lane.b32.xlu0 %v4453_v28, %s4768_s12  ;;  %s3513_s29 = sshll.u32 %s4080_s21, 7  ;;  %s3998_s21 = smov [#allocation2]  }
 0xbd6   : > { %1958 = vrot.lane.b32.xlu1 %v4453_v28, %s4769_s30  ;;  %1961 = vrot.lane.b32.xlu0 %v4453_v28, %s4770_s13  ;;  %s4776_s13 = smov 16  }
 0xbda   : > { %1964 = vrot.lane.b32.xlu1 %v4453_v28, %s4771_s16  ;;  %1979 = vrot.lane.b32.xlu0 %v4453_v28, %s4772_s15  ;;  %s4777_s16 = smov 8   ;;  %s4778_s15 = smov 24  }
 0xbde   : > { %1982 = vrot.lane.b32.xlu1 %v4453_v28, %s4773_s14  ;;  %s388_s14 = sand.u32 1, %s3968_s18  }
 0xc40   : > { %v1971_v22 = vpop.permute.xlu1 %1970  ;;  %v1968_v30 = vpop.permute.xlu0 %1967 }
 0xc44   : > { %v1974_v31 = vpop.permute.xlu1 %1973  ;;  %v1977_v32 = vpop.permute.xlu0 %1976 }
 0xc45   : > { %v2023_v33 = vcombine.low %v1968_v30, %v1974_v31  ;;  %v2024_v37 = vcombine.high %v1968_v30, %v1974_v31  ;;  %v2039_v38 = vcombine.low %v1971_v22, %v1977_v32  ;;  %v2040_v41 = vcombine.high %v1971_v22, %v1977_v32 }
 0xc47   : > { %v2031_v43 = vrot.slane %v2023_v33, %v4206_v40  ;;  %v2038_v44 = vrot.slane %v2024_v37, %v4206_v40  ;;  %v2047_v45 = vrot.slane %v2039_v38, %v4206_v40  ;;  %v2054_v46 = vrot.slane %v2040_v41, %v4206_v40 }
 0xc48   : > { %v1959_v27 = vpop.permute.xlu1 %1958  ;;  %v1962_v52 = vpop.permute.xlu0 %1961 }
 0xc49   : > { %v2087_v48 = vcombine.low %v2031_v43, %v2047_v45  ;;  %v2088_v49 = vcombine.high %v2031_v43, %v2047_v45  ;;  %v2103_v50 = vcombine.low %v2038_v44, %v2054_v46  ;;  %v2104_v51 = vcombine.high %v2038_v44, %v2054_v46 }
 0xc4a   : > { %v1991_v39 = vcombine.low %v4453_v28, %v1962_v52  ;;  %v1992_v58 = vcombine.high %v4453_v28, %v1962_v52 }
 0xc4b   : > { %v2095_v53 = vrot.slane %v2087_v48, %v4209_v47  ;;  %v2102_v54 = vrot.slane %v2088_v49, %v4209_v47  ;;  %v2111_v55 = vrot.slane %v2103_v50, %v4209_v47  ;;  %v2118_v56 = vrot.slane %v2104_v51, %v4209_v47 }
 0xc4c   : > { %v1965_v42 = vpop.permute.xlu1 %1964  ;;  %v1999_v6 = vrot.slane %v1991_v39, %v4206_v40  ;;  %v2006_v7 = vrot.slane %v1992_v58, %v4206_v40 }
 0xc4d   : > { %v3461_v59 = vcombine.low %v2095_v53, %v2102_v54  ;;  %v3463_v60 = vcombine.high %v2095_v53, %v2102_v54  ;;  %v3465_v61 = vcombine.low %v2111_v55, %v2118_v56  ;;  %v3467_v62 = vcombine.high %v2111_v55, %v2118_v56 }
 0xc4e   : > { %v2007_v63 = vcombine.low %v1959_v27, %v1965_v42  ;;  %v2008_v0 = vcombine.high %v1959_v27, %v1965_v42 }
 0xc4f   : > { %v2210_v1 = vrot.slane %v3461_v59, %v4206_v40  ;;  %v2226_v3 = vrot.slane %v3463_v60, %v4206_v40  ;;  %v2242_v4 = vrot.slane %v3465_v61, %v4206_v40  ;;  %v2258_v5 = vrot.slane %v3467_v62, %v4206_v40 }
 0xc50   : > { %v2015_v8 = vrot.slane %v2007_v63, %v4206_v40  ;;  %v2022_v9 = vrot.slane %v2008_v0, %v4206_v40 }
 0xc51   : > { %v2275_v13 = vcombine.low %v2210_v1, %v2226_v3  ;;  %v2307_v17 = vcombine.low %v2242_v4, %v2258_v5  ;;  %v2276_v26 = vcombine.high %v2210_v1, %v2226_v3  ;;  %v2308_v29 = vcombine.high %v2242_v4, %v2258_v5 }
 0xc52   : > { %v2055_v18 = vcombine.low %v1999_v6, %v2015_v8  ;;  %v2056_v19 = vcombine.high %v1999_v6, %v2015_v8  ;;  %v2071_v20 = vcombine.low %v2006_v7, %v2022_v9  ;;  %v2072_v21 = vcombine.high %v2006_v7, %v2022_v9 }
 0xc53   : > { %v2283_v24 = vrot.slane %v2275_v13, %v4209_v47  ;;  %v2315_v25 = vrot.slane %v2307_v17, %v4209_v47  ;;  %v2290_v45 = vrot.slane %v2276_v26, %v4209_v47  ;;  %v2322_v46 = vrot.slane %v2308_v29, %v4209_v47 }
 0xc54   : > { %v2063_v11 = vrot.slane %v2055_v18, %v4209_v47  ;;  %v2070_v12 = vrot.slane %v2056_v19, %v4209_v47  ;;  %v2079_v22 = vrot.slane %v2071_v20, %v4209_v47  ;;  %v2086_v30 = vrot.slane %v2072_v21, %v4209_v47 }
 0xc55   : > { %v2327_v31 = vcombine.low %v2283_v24, %v2315_v25  ;;  %v2328_v32 = vcombine.high %v2283_v24, %v2315_v25  ;;  %v2329_v42 = vcombine.low %v2290_v45, %v2322_v46  ;;  %v2330_v59 = vcombine.high %v2290_v45, %v2322_v46 }
 0xc56   : > { %v3460_v33 = vcombine.low %v2063_v11, %v2070_v12  ;;  %v3462_v37 = vcombine.high %v2063_v11, %v2070_v12  ;;  %v3464_v38 = vcombine.low %v2079_v22, %v2086_v30  ;;  %v3466_v41 = vcombine.high %v2079_v22, %v2086_v30 }
 0xc57   : > { %v2407_v43 = vpack.c.bf16 %v2327_v31, %v2327_v31  ;;  %v2408_v44 = vpack.c.bf16 %v2328_v32, %v2328_v32  ;;  %v2409_v3 = vpack.c.bf16 %v2329_v42, %v2329_v42  ;;  %v2410_v4 = vpack.c.bf16 %v2330_v59, %v2330_v59 }
 0xc58   : > { %v2203_v27 = vrot.slane %v3460_v33, %v4206_v40  ;;  %v2219_v48 = vrot.slane %v3462_v37, %v4206_v40  ;;  %v2235_v49 = vrot.slane %v3464_v38, %v4206_v40  ;;  %v2251_v50 = vrot.slane %v3466_v41, %v4206_v40 }
 0xc59   : > { %v2419_v51 = vsel %vm1047_vm4, %v2407_v43, 0  ;;  %v2465_v52 = vsel %vm1047_vm4, %v2408_v44, 0  ;;  %v2511_v9 = vsel %vm1047_vm4, %v2409_v3, 0  ;;  %v2557_v13 = vsel %vm1047_vm4, %v2410_v4, 0 }
 0xc5a   : > { %v2259_v53 = vcombine.low %v2203_v27, %v2219_v48  ;;  %v2260_v54 = vcombine.high %v2203_v27, %v2219_v48  ;;  %v2291_v55 = vcombine.low %v2235_v49, %v2251_v50  ;;  %v2292_v56 = vcombine.high %v2235_v49, %v2251_v50  ;;  %3701 = vmatpush3.bf16.xpose.msra.mxu0 %v2419_v51 }
 0xc5b   : > { %3707 = vmatpush3.bf16.xpose.msra.mxu1 %v2465_v52  ;;  %3712 = vmatprep.subr.bf16.mxu0 %v3979_v2  ;;  %v1980_v52 = vpop.permute.xlu0 %1979 }
 0xc5c   : > { %3718 = vmatprep.subr.bf16.mxu1 %v3979_v2  ;;  %v2267_v39 = vrot.slane %v2259_v53, %v4209_v47  ;;  %v2299_v58 = vrot.slane %v2291_v55, %v4209_v47  ;;  %v2274_v62 = vrot.slane %v2260_v54, %v4209_v47  ;;  %v2306_v63 = vrot.slane %v2292_v56, %v4209_v47  ;;  %v1983_v53 = vpop.permute.xlu1 %1982 }
 0xc5e   : > { %v2323_v60 = vcombine.low %v2267_v39, %v2299_v58  ;;  %v2324_v61 = vcombine.high %v2267_v39, %v2299_v58  ;;  %v2325_v7 = vcombine.low %v2274_v62, %v2306_v63  ;;  %v2326_v8 = vcombine.high %v2274_v62, %v2306_v63 }
 0xc60   : > { %v2399_v0 = vmul.f32 0.35355338, %v2323_v60  ;;  %v2400_v1 = vmul.f32 0.35355338, %v2324_v61  ;;  %v2401_v17 = vmul.f32 0.35355338, %v2325_v7 }
 0xc61   : > { %v2402_v18 = vmul.f32 0.35355338, %v2326_v8 }
 0xc62   : > { %v2403_v5 = vpack.c.bf16 %v2399_v0, %v2399_v0  ;;  %v2404_v6 = vpack.c.bf16 %v2400_v1, %v2400_v1  ;;  %v2405_v19 = vpack.c.bf16 %v2401_v17, %v2401_v17 }
 0xc63   : > { %v2406_v20 = vpack.c.bf16 %v2402_v18, %v2402_v18 }
 0xc64   : > { %3703 = vmatmul.mubr.msk.bf16.vlgmr.msra.gmra.mrb[24].mxu0 %vm1047_vm4, %v2403_v5  ;;  %3709 = vmatmul.mubr.msk.bf16.vlgmr.msra.gmra.mrb[32].mxu1 %vm1047_vm4, %v2404_v6 }
 0xc65   : > { %3713 = vmatpush3.bf16.xpose.msra.mxu0 %v2511_v9  ;;  %3719 = vmatpush3.bf16.xpose.msra.mxu1 %v2557_v13 }
 0xc66   : > { %3714 = vmatprep.mubr.msk.bf16.mxu0 %vm3980_vm0, %v3979_v2  ;;  %3720 = vmatprep.mubr.msk.bf16.mxu1 %vm3980_vm0, %v3979_v2 }
 0xc67   : > { %3724 = vmatprep.subr.bf16.mxu0 %v3979_v2  ;;  %3730 = vmatprep.subr.bf16.mxu1 %v3979_v2 }
 0xc6c   : > { %3715 = vmatmul.mubr.msk.bf16.vlgmr.msra.gmra.mrb[28].mxu0 %vm1047_vm4, %v2405_v19  ;;  %3721 = vmatmul.mubr.msk.bf16.vlgmr.msra.gmra.mrb[36].mxu1 %vm1047_vm4, %v2406_v20 }
 0xc6d   : > { %3726 = vmatprep.mubr.msk.bf16.mxu0 %vm3980_vm0, %v3979_v2  ;;  %3732 = vmatprep.mubr.msk.bf16.mxu1 %vm3980_vm0, %v3979_v2 }
 0xd37   : > { %v2455_v21 = vpop.f32.mrb[24].mxu0  ;;  %v2501_v24 = vpop.f32.mrb[32].mxu1 }
 0xd38   : > { %v2599_v25 = vsel %vm4267_vm5, %v2455_v21, -1e+09  ;;  %v2600_v26 = vsel %vm4267_vm5, %v2501_v24, -1e+09  ;;  %v3704_v29 = vpop.f32.mrb[25].mxu0  ;;  %v3710_v11 = vpop.f32.mrb[33].mxu1 }
 0xd39   : > { %v2458_v12 = vpop.f32.mrb[26].mxu0  ;;  %v2504_v22 = vpop.f32.mrb[34].mxu1  ;;  %v2606_v30 = vsel %vm1047_vm4, %v2600_v26, -inf  ;;  %v2603_v31 = vsel %vm1047_vm4, %v2599_v25, -inf }
 0xd3a   : > { %2607 = vmax.xlane.f32.xlu1 %v2606_v30  ;;  %v3711_v32 = vpop.f32.mrb[35].mxu1  ;;  %2604 = vmax.xlane.f32.xlu0 %v2603_v31  ;;  %v3705_v33 = vpop.f32.mrb[27].mxu0 }
 0xd3f   : > { %v2547_v37 = vpop.f32.mrb[28].mxu0  ;;  %v2593_v38 = vpop.f32.mrb[36].mxu1 }
 0xd40   : > { %v3716_v41 = vpop.f32.mrb[29].mxu0  ;;  %v3722_v43 = vpop.f32.mrb[37].mxu1  ;;  %v4539_v48 = vsel %vm4267_vm5, %v2547_v37, -1e+09  ;;  %v4543_v49 = vsel %vm4267_vm5, %v2593_v38, -1e+09 }
 0xd41   : > { %v2550_v44 = vpop.f32.mrb[30].mxu0  ;;  %v2596_v45 = vpop.f32.mrb[38].mxu1  ;;  %v2612_v50 = vsel %vm1047_vm4, %v4543_v49, -inf  ;;  %v2609_v51 = vsel %vm1047_vm4, %v4539_v48, -inf }
 0xd42   : > { %v3717_v46 = vpop.f32.mrb[31].mxu0  ;;  %v3723_v27 = vpop.f32.mrb[39].mxu1 }
 0xd4b   : > { %1988 = vrot.lane.b32.xlu1 %v4453_v28, %s4774_s22  ;;  %s3400_s22 = sshll.u32 %s388_s14, 3 }
 0xd50   : > { %1985 = vrot.lane.b32.xlu0 %v4453_v28, %s4775_s24  ;;  %s390_s24 = scalar_lea.vmem [#allocation2], %s3400_s22  ;;  %s3918_s22 = sshll.u32 %s3998_s21, 4  ;;  %s3919_s22 = int_to_ptr.vmem [resolvable:$false] %s3918_s22 }
 0xd51   : > { %s3325_s25 = sshll.u32 %s390_s24, 4  ;;  %s3920_s0 = scalar_lea.vmem %s3919_s22, 256  ;;  %s4692_s25 = int_to_ptr.vmem [resolvable:$true] %s3325_s25 }
 0xd52   : > { %p3921_p0 = scmp.lt.s32.totalorder %s4692_s25, %s3919_s22 }
 0xd6f   : > { %2613 = vmax.xlane.f32.xlu1 %v2612_v50  ;;  %2610 = vmax.xlane.f32.xlu0 %v2609_v51 }
 0xdc7   : > { %v2608_v54 = vpop.xlane.xlu1 %2607  ;;  %v2605_v28 = vpop.xlane.xlu0 %2604 }
 0xdc8   : > { %v2616_v55 = vsub.f32 %v2600_v26, %v2608_v54  ;;  %v2615_v56 = vsub.f32 %v2599_v25, %v2605_v28 }
 0xdca   : > { %v2619_v39 = vmul.f32 1.442695, %v2615_v56  ;;  %v2621_v58 = vmul.f32 1.442695, %v2616_v55 }
 0xdcb   : > { %v1989_v42 = vpop.permute.xlu1 %1988  ;;  %v1986_v16 = vpop.permute.xlu0 %1985 }
 0xdcc   : > { %v2143_v59 = vcombine.low %v1983_v53, %v1989_v42  ;;  %v2144_v60 = vcombine.high %v1983_v53, %v1989_v42  ;;  %v2127_v61 = vcombine.low %v1980_v52, %v1986_v16  ;;  %3894 = vpow2.f32 %v2619_v39 }
 0xdcd   : > { %v2128_v62 = vcombine.high %v1980_v52, %v1986_v16  ;;  %3896 = vpow2.f32 %v2621_v58 }
 0xdce   : > { %v2151_v63 = vrot.slane %v2143_v59, %v4206_v40  ;;  %v2158_v0 = vrot.slane %v2144_v60, %v4206_v40  ;;  %v2135_v1 = vrot.slane %v2127_v61, %v4206_v40 }
 0xdcf   : > { %v2142_v3 = vrot.slane %v2128_v62, %v4206_v40 }
 0xdd0   : > { %v2159_v4 = vcombine.low %v2135_v1, %v2151_v63  ;;  %v2160_v5 = vcombine.high %v2135_v1, %v2151_v63 }
 0xdd1   : > { %v2175_v6 = vcombine.low %v2142_v3, %v2158_v0  ;;  %v2176_v7 = vcombine.high %v2142_v3, %v2158_v0 }
 0xdd2   : > { %v2167_v8 = vrot.slane %v2159_v4, %v4209_v47  ;;  %v2174_v9 = vrot.slane %v2160_v5, %v4209_v47 }
 0xdd3   : > { %v2183_v13 = vrot.slane %v2175_v6, %v4209_v47  ;;  %v2190_v17 = vrot.slane %v2176_v7, %v4209_v47 }
 0xdd4   : > { %v2331_v18 = vcombine.low %v2167_v8, %v2174_v9  ;;  %v3468_v19 = vcombine.high %v2167_v8, %v2174_v9 }
 0xdd5   : > { %v2347_v20 = vcombine.low %v2183_v13, %v2190_v17  ;;  %v3469_v21 = vcombine.high %v2183_v13, %v2190_v17 }
 0xdd6   : > { %v2338_v24 = vrot.slane %v2331_v18, %v4206_v40  ;;  %v2346_v25 = vrot.slane %v3468_v19, %v4206_v40  ;;  %v3895_v26 = vpop.eup %3894 }
 0xdd7   : > { %v2354_v29 = vrot.slane %v2347_v20, %v4206_v40  ;;  %v2362_v11 = vrot.slane %v3469_v21, %v4206_v40  ;;  %v2627_v12 = vsel %vm1047_vm4, %v3895_v26, 0.0  ;;  %v3897_v31 = vpop.eup %3896  ;;  %v2639_v56 = vpack.c.bf16 %v3895_v26, %v3895_v26 }
 0xdd8   : > { %v2363_v22 = vcombine.low %v2338_v24, %v2346_v25  ;;  %v2364_v30 = vcombine.high %v2338_v24, %v2346_v25  ;;  %2628 = vadd.xlane.f32.xlu0 %v2627_v12  ;;  %v2630_v44 = vsel %vm1047_vm4, %v3897_v31, 0.0  ;;  %v2640_v39 = vpack.c.bf16 %v3897_v31, %v3897_v31 }
 0xdd9   : > { %v2379_v32 = vcombine.low %v2354_v29, %v2362_v11  ;;  %v2380_v33 = vcombine.high %v2354_v29, %v2362_v11 }
 0xdda   : > { %v2371_v37 = vrot.slane %v2363_v22, %v4209_v47  ;;  %v2378_v38 = vrot.slane %v2364_v30, %v4209_v47 }
 0xddb   : > { %v2387_v41 = vrot.slane %v2379_v32, %v4209_v47  ;;  %v2394_v43 = vrot.slane %v2380_v33, %v4209_v47 }
 0xddc   : > { %2631 = vadd.xlane.f32.xlu0 %v2630_v44 }
 0xddd   : > { %v2395_v45 = vcombine.low %v2371_v37, %v2387_v41  ;;  %v2396_v46 = vcombine.high %v2371_v37, %v2387_v41  ;;  %v2397_v27 = vcombine.low %v2378_v38, %v2394_v43  ;;  %v2398_v50 = vcombine.high %v2378_v38, %v2394_v43 }
 0xddf   : > { %v2411_v51 = vpack.c.bf16 %v2395_v45, %v2395_v45  ;;  %v2412_v52 = vpack.c.bf16 %v2396_v46, %v2396_v46  ;;  %v2413_v28 = vpack.c.bf16 %v2397_v27, %v2397_v27  ;;  %v2414_v55 = vpack.c.bf16 %v2398_v50, %v2398_v50 }
 0xde1   : > { %v2647_v53 = vsel %vm1281_vm6, %v2411_v51, 0  ;;  %v2693_v54 = vsel %vm1281_vm6, %v2412_v52, 0  ;;  %v2739_v58 = vsel %vm1281_vm6, %v2413_v28, 0  ;;  %v2785_v42 = vsel %vm1281_vm6, %v2414_v55, 0 }
 0xde2   : > { %3725 = vmatpush3.bf16.msra.mxu0 %v2647_v53  ;;  %3731 = vmatpush3.bf16.msra.mxu1 %v2693_v54 }
 0xde3   : > { %3736 = vmatprep.subr.bf16.mxu0 %v3979_v2  ;;  %3742 = vmatprep.subr.bf16.mxu1 %v3979_v2 }
 0xde5   : > { %3727 = vmatmul.mubr.msk.bf16.vlgmr.msra.gmra.mrb[32].mxu0 %vm1047_vm4, %v2639_v56  ;;  %3733 = vmatmul.mubr.msk.bf16.vlgmr.msra.gmra.mrb[40].mxu1 %vm1047_vm4, %v2640_v39 }
 0xde6   : > { %3737 = vmatpush3.bf16.msra.mxu0 %v2739_v58  ;;  %3743 = vmatpush3.bf16.msra.mxu1 %v2785_v42 }
 0xde7   : > { %3738 = vmatprep.mubr.msk.bf16.mxu0 %vm3980_vm0, %v3979_v2  ;;  %3744 = vmatprep.mubr.msk.bf16.mxu1 %vm3980_vm0, %v3979_v2 }
 0xde8   : > { %3748 = vmatprep.subr.bf16.mxu0 %v3979_v2  ;;  %3756 = vmatprep.subr.bf16.mxu1 %v3979_v2 }
 0xdfc   : > { %v2614_v16 = vpop.xlane.xlu1 %2613  ;;  %v2611_v59 = vpop.xlane.xlu0 %2610 }
 0xdfd   : > { %v2618_v60 = vsub.f32 %v4543_v49, %v2614_v16  ;;  %v2617_v61 = vsub.f32 %v4539_v48, %v2611_v59  ;;  %v3864_v48 = vld [vmem:[%s4743_s6 + $0x10] sm:$0xff]   ;;  %v3865_v16 = vld [vmem:[%s4743_s6 + $0x18] sm:$0xff]  }
 0xdff   : > { %v2625_v62 = vmul.f32 1.442695, %v2618_v60  ;;  %v2623_v63 = vmul.f32 1.442695, %v2617_v61 }
 0xe01   : > { %3898 = vpow2.f32 %v2625_v62 }
 0xe02   : > { %3900 = vpow2.f32 %v2623_v63 }
 0xe0b   : > { %v3899_v0 = vpop.eup %3898 }
 0xe0c   : > { %v3901_v1 = vpop.eup %3900  ;;  %v2636_v3 = vsel %vm1047_vm4, %v3899_v0, 0.0  ;;  %v2642_v4 = vpack.c.bf16 %v3899_v0, %v3899_v0 }
 0xe0d   : > { %2637 = vadd.xlane.f32.xlu0 %v2636_v3  ;;  %v2633_v5 = vsel %vm1047_vm4, %v3901_v1, 0.0  ;;  %v2641_v6 = vpack.c.bf16 %v3901_v1, %v3901_v1 }
 0xe0e   : > { %2634 = vadd.xlane.f32.xlu1 %v2633_v5  ;;  %3745 = vmatmul.mubr.msk.bf16.vlgmr.msra.gmra.mrb[44].mxu1 %vm1047_vm4, %v2642_v4 }
 0xe0f   : > { %3739 = vmatmul.mubr.msk.bf16.vlgmr.msra.gmra.mrb[36].mxu0 %vm1047_vm4, %v2641_v6  ;;  %3760 = vmatprep.mubr.msk.bf16.mxu1 %vm3980_vm0, %v3979_v2 }
 0xe10   : > { %3752 = vmatprep.mubr.msk.bf16.mxu0 %vm3980_vm0, %v3979_v2  ;;  %3749 = vmatpush3.bf16.msra.mxu0 %v3864_v48 }
 0xe11   : > { %3750 = vmatprep.subr.bf16.mxu0 %v3979_v2 }
 0xe14   : > { %3751 = vmatpush3.bf16.msra.mxu0 %v3865_v16 }
 0xe15   : > { %3764 = vmatprep.subr.bf16.mxu0 %v3979_v2 }
 0xe65   : > { %v2629_v20 = vpop.xlane.xlu0 %2628 }
 0xe66   : > { %3902 = vrcp.f32 %v2629_v20 }
 0xe69   : > { %v2632_v21 = vpop.xlane.xlu0 %2631 }
 0xe6a   : > { %3904 = vrcp.f32 %v2632_v21 }
 0xe70   : > { %v3903_v26 = vpop.eup %3902 }
 0xe74   : > { %v3905_v29 = vpop.eup %3904 }
 0xe9a   : > { %v2638_v24 = vpop.xlane.xlu0 %2637 }
 0xe9b   : > { %v2635_v25 = vpop.xlane.xlu1 %2634  ;;  %3906 = vrcp.f32 %v2638_v24 }
 0xe9c   : > { %3908 = vrcp.f32 %v2635_v25 }
 0xea5   : > { %v3907_v11 = vpop.eup %3906 }
 0xea6   : > { %v3909_v22 = vpop.eup %3908 }
 0xeb8   : > { %v2683_v49 = vpop.f32.mrb[32].mxu0  ;;  %v2729_v7 = vpop.f32.mrb[40].mxu1 }
 0xeb9   : > { %v3728_v8 = vpop.f32.mrb[33].mxu0  ;;  %v3734_v9 = vpop.f32.mrb[41].mxu1  ;;  %v2832_v30 = vmul.f32 %v3905_v29, %v2729_v7  ;;  %v2831_v37 = vmul.f32 %v3903_v26, %v2683_v49 }
 0xeba   : > { %v2686_v13 = vpop.f32.mrb[34].mxu0  ;;  %v2732_v17 = vpop.f32.mrb[42].mxu1 }
 0xebb   : > { %v3729_v18 = vpop.f32.mrb[35].mxu0  ;;  %v3735_v19 = vpop.f32.mrb[43].mxu1 }
 0xee1   : > { %v2821_v12 = vpop.f32.mrb[44].mxu1 }
 0xee2   : > { %v2775_v31 = vpop.f32.mrb[36].mxu0  ;;  %v2834_v32 = vmul.f32 %v3907_v11, %v2821_v12  ;;  %v3746_v33 = vpop.f32.mrb[45].mxu1 }
 0xee3   : > { %v2833_v38 = vmul.f32 %v3909_v22, %v2775_v31  ;;  %v3740_v41 = vpop.f32.mrb[37].mxu0  ;;  %v2824_v43 = vpop.f32.mrb[46].mxu1 }
 0xee4   : > { %v2851_v44 = vcombine.low %v2832_v30, %v2834_v32  ;;  %v2852_v45 = vcombine.high %v2832_v30, %v2834_v32  ;;  %v2778_v46 = vpop.f32.mrb[38].mxu0  ;;  %v3747_v27 = vpop.f32.mrb[47].mxu1  ;;  %v4627_v30 = vld [vmem:[%s4747_s10 + $0x8] sm:$0x3f] }
 0xee5   : > { %v2835_v50 = vcombine.low %v2831_v37, %v2833_v38  ;;  %v2836_v51 = vcombine.high %v2831_v37, %v2833_v38  ;;  %v3741_v52 = vpop.f32.mrb[39].mxu0  ;;  %v2995_v31 = vrot.slane %v4627_v30, %v1631_v10  ;;  %v3866_v10 = vld [vmem:[%s4744_s7 + $0x10] sm:$0xff]  }
 0xee6   : > { %v2859_v53 = vrot.slane %v2851_v44, %v4206_v40  ;;  %v2866_v54 = vrot.slane %v2852_v45, %v4206_v40  ;;  %3757 = vmatpush3.bf16.msra.mxu1 %v3866_v10  ;;  %v3868_v52 = vld [vmem:[%s4746_s9 + $0x20] sm:$0xff]  }
 0xee7   : > { %v2843_v28 = vrot.slane %v2835_v50, %v4206_v40  ;;  %v2850_v55 = vrot.slane %v2836_v51, %v4206_v40  ;;  %3758 = vmatprep.subr.bf16.mxu1 %v3979_v2 }
 0xee9   : > { %v2867_v56 = vcombine.low %v2843_v28, %v2859_v53  ;;  %v2868_v39 = vcombine.high %v2843_v28, %v2859_v53  ;;  %v2883_v58 = vcombine.low %v2850_v55, %v2866_v54  ;;  %v2884_v42 = vcombine.high %v2850_v55, %v2866_v54  ;;  %v3869_v53 = vld [vmem:[%s4746_s9 + $0x28] sm:$0xff]  }
 0xeeb   : > { %v2875_v59 = vrot.slane %v2867_v56, %v4209_v47  ;;  %v2882_v60 = vrot.slane %v2868_v39, %v4209_v47  ;;  %v2891_v61 = vrot.slane %v2883_v58, %v4209_v47  ;;  %v2898_v62 = vrot.slane %v2884_v42, %v4209_v47 }
 0xeec   : > { %v3068_v56 = vrot.slane %v4627_v30, %v1705_v34  ;;  %v3073_v42 = vrot.slane %v4627_v30, %v1710_v36  ;;  %v3871_v34 = vld [vmem:[%s4746_s9 + $0x38] sm:$0xff]   ;;  %v3492_v36 = vld [vmem:[%s4745_s8 + $0x1] ss:$0 sm:$0xff] }
 0xeed   : > { %v2903_v63 = vcombine.low %v2875_v59, %v2882_v60  ;;  %v3478_v0 = vcombine.high %v2875_v59, %v2882_v60  ;;  %v2919_v1 = vcombine.low %v2891_v61, %v2898_v62  ;;  %v3479_v3 = vcombine.high %v2891_v61, %v2898_v62  ;;  %v3870_v61 = vld [vmem:[%s4746_s9 + $0x30] sm:$0xff]  }
 0xeef   : > { %v2910_v4 = vrot.slane %v2903_v63, %v4206_v40  ;;  %v2918_v5 = vrot.slane %v3478_v0, %v4206_v40  ;;  %v2926_v6 = vrot.slane %v2919_v1, %v4206_v40  ;;  %v2934_v48 = vrot.slane %v3479_v3, %v4206_v40 }
 0xef1   : > { %v2936_v49 = vcombine.high %v2910_v4, %v2918_v5  ;;  %v2952_v7 = vcombine.high %v2926_v6, %v2934_v48  ;;  %v2935_v8 = vcombine.low %v2910_v4, %v2918_v5  ;;  %v2951_v9 = vcombine.low %v2926_v6, %v2934_v48 }
 0xef2   : > { %v3158_v6 = vrot.slane %v4627_v30, %v1792_v57  ;;  %v3872_v57 = vld [vmem:[%s4740_s3] sm:$0xff]  }
 0xef3   : > { %v2950_v13 = vrot.slane %v2936_v49, %v4209_v47  ;;  %v2966_v17 = vrot.slane %v2952_v7, %v4209_v47  ;;  %v2943_v18 = vrot.slane %v2935_v8, %v4209_v47  ;;  %v2959_v19 = vrot.slane %v2951_v9, %v4209_v47 }
 0xef5   : > { %v2969_v20 = vcombine.low %v2950_v13, %v2966_v17  ;;  %v2968_v21 = vcombine.high %v2943_v18, %v2959_v19  ;;  %v2970_v24 = vcombine.high %v2950_v13, %v2966_v17  ;;  %v2967_v25 = vcombine.low %v2943_v18, %v2959_v19 }
 0xef7   : > { %2976 = vrot.lane.b32.xlu0 %v2969_v20, %s4776_s13  ;;  %2972 = vrot.lane.b32.xlu1 %v2968_v21, %s4777_s16  ;;  %s4697_s13 = scalar_lea.hbm %s4748_s11, %s3513_s29  ;;  %s3312_s16 = scalar_lea.sflag [#allocation3], %s388_s14 }
 0xefb   : > { %2980 = vrot.lane.b32.xlu1 %v2970_v24, %s4778_s15  ;;  %s3914_s15 = scalar_lea.vmem %s4692_s25, 128 }
 0xefc   : > { %p3915_p11 = scmp.ne.s32.totalorder %s4692_s25, %s3914_s15  ;;  %p3922_p1 = scmp.lt.s32.totalorder %s3920_s0, %s3914_s15 }
 0xefe   : > { %p3916_p12 = pnand %p3915_p11, %p4097_p5  ;;  %p3923_p2 = por %p3922_p1, %p3921_p0 }
 0xf00   : > { %p3917_p13 = pneg %p3916_p12 }
 0xf02   : > { %p3924_p3 = pnand %p3923_p2, %p3917_p13 }
 0xf69   : > { %v2973_v40 = vpop.permute.xlu1 %2972  ;;  %v2977_v26 = vpop.permute.xlu0 %2976 }
 0xf6a   : > { %v2983_v29 = vsel %vm1047_vm4, %v2967_v25, %v2973_v40  ;;  %v3873_v25 = vld [vmem:[%s4740_s3 + $0x8] sm:$0xff]  }
 0xf6b   : > { %v2984_v12 = vsel %vm1620_vm7, %v2983_v29, %v2977_v26 }
 0xf6d   : > { %v2981_v11 = vpop.permute.xlu1 %2980 }
 0xf6e   : > { %v2985_v22 = vsel %vm1622_vm8, %v2984_v12, %v2981_v11  ;;  %v3243_v11 = vrot.slane %v4627_v30, %v1878_v14 }
 0xf6f   : > { %v2986_v47 = vpack.c.bf16 %v2985_v22, %v2985_v22 }
 0xf71   : > { %3753 = vmatmul.mubr.msk.bf16.vlgmr.msra.gmra.mrb[40].mxu0 %vm545_vm3, %v2986_v47 }
 0xf72   : > { %3772 = vmatprep.mubr.msk.bf16.mxu0 %vm3980_vm0, %v3979_v2  ;;  %3765 = vmatpush3.bf16.msra.mxu0 %v3868_v52 }
 0xf73   : > { %3766 = vmatprep.subr.bf16.mxu0 %v3979_v2 }
 0xf76   : > { %3767 = vmatpush3.bf16.msra.mxu0 %v3869_v53 }
 0xf77   : > { %3768 = vmatprep.subr.bf16.mxu0 %v3979_v2 }
 0xf7a   : > { %3769 = vmatpush3.bf16.msra.mxu0 %v3870_v61 }
 0xf7b   : > { %3770 = vmatprep.subr.bf16.mxu0 %v3979_v2 }
 0xf7e   : > { %3771 = vmatpush3.bf16.msra.mxu0 %v3871_v34 }
0x1044   : > { %v3045_v32 = vpop.f32.mrb[40].mxu0 }
0x1045   : > { %v3046_v33 = vadd.f32 %v3045_v32, %v2995_v31  ;;  %v3754_v37 = vpop.f32.mrb[41].mxu0 }
0x1046   : > { %v3048_v38 = vpop.f32.mrb[42].mxu0 }
0x1047   : > { %v3755_v41 = vpop.f32.mrb[43].mxu0  ;;  %v3051_v43 = vadd.f32 %v3046_v33, %v4443_v23  ;;  %v3867_v23 = vld [vmem:[%s4744_s7 + $0x18] sm:$0xff]  }
0x1048   : > { %3759 = vmatpush3.bf16.msra.mxu1 %v3867_v23 }
0x1049   : > { %v3052_v44 = vsel %vm545_vm3, %v3051_v43, 0.0  ;;  %3776 = vmatprep.subr.bf16.mxu1 %v3979_v2 }
0x104a   : > { %3053 = vadd.xlane.f32.xlu1 %v3052_v44 }
0x10d7   : > { %v3054_v45 = vpop.xlane.xlu1 %3053 }
0x10d8   : > { %v3055_v46 = vmul.f32 0.03125, %v3054_v45 }
0x10da   : > { %v3056_v27 = vsub.f32 %v3051_v43, %v3055_v46 }
0x10dc   : > { %v3057_v50 = vmul.f32 %v3056_v27, %v3056_v27 }
0x10de   : > { %v3058_v51 = vsel %vm545_vm3, %v3057_v50, 0.0 }
0x10df   : > { %3059 = vadd.xlane.f32.xlu0 %v3058_v51 }
0x116c   : > { %v3060_v54 = vpop.xlane.xlu0 %3059 }
0x116d   : > { %v3061_v28 = vmul.f32 0.03125, %v3060_v54 }
0x116f   : > { %v3062_v55 = vadd.f32 1e-05, %v3061_v28 }
0x1171   : > { %3910 = vrsqrt.f32 %v3062_v55 }
0x117b   : > { %v3911_v39 = vpop.eup %3910 }
0x117c   : > { %v3064_v58 = vmul.f32 %v3911_v39, %v3056_v27 }
0x117e   : > { %v3069_v16 = vmul.f32 %v3068_v56, %v3064_v58 }
0x1180   : > { %v3074_v59 = vadd.f32 %v3073_v42, %v3069_v16 }
0x1182   : > { %v3075_v60 = vpack.c.bf16 %v3074_v59, %v3074_v59 }
0x1184   : > { %3761 = vmatmul.mubr.msk.bf16.vlgmr.msra.gmra.mrb[48].mxu1 %vm545_vm3, %v3075_v60 }
0x1185   : > { %3780 = vmatprep.mubr.msk.bf16.mxu1 %vm3980_vm0, %v3979_v2  ;;  %3777 = vmatpush3.bf16.msra.mxu1 %v3872_v57 }
0x1186   : > { %3778 = vmatprep.subr.bf16.mxu1 %v3979_v2  ;;  %v3248_v2 = vrot.slane %v4627_v30, %v1883_v15 }
0x1189   : > { %3779 = vmatpush3.bf16.msra.mxu1 %v3873_v25 }
0x1257   : > { %v3138_v62 = vpop.f32.mrb[48].mxu1 }
0x1258   : > { %v3139_v63 = vadd.f32 %v3492_v36, %v3138_v62  ;;  %v3762_v0 = vpop.f32.mrb[49].mxu1 }
0x1259   : > { %v3141_v1 = vpop.f32.mrb[50].mxu1 }
0x125a   : > { %v3144_v3 = vmax.f32 %v3139_v63, 0.0  ;;  %v3763_v4 = vpop.f32.mrb[51].mxu1 }
0x125c   : > { %v3145_v5 = vpack.c.bf16 %v3144_v3, %v3144_v3 }
0x125e   : > { %3773 = vmatmul.mubr.msk.bf16.vlgmr.msra.gmra.mrb[44].mxu0 %vm1818_vm9, %v3145_v5 }
0x1331   : > { %v3220_v48 = vpop.f32.mrb[44].mxu0 }
0x1332   : > { %v3221_v49 = vadd.f32 %v3220_v48, %v3158_v6  ;;  %v3774_v7 = vpop.f32.mrb[45].mxu0 }
0x1333   : > { %v3223_v8 = vpop.f32.mrb[46].mxu0 }
0x1334   : > { %v3775_v9 = vpop.f32.mrb[47].mxu0  ;;  %v3226_v13 = vadd.f32 %v3221_v49, %v3074_v59 }
0x1336   : > { %v3227_v17 = vsel %vm545_vm3, %v3226_v13, 0.0 }
0x1337   : > { %3228 = vadd.xlane.f32.xlu0 %v3227_v17 }
0x13c4   : > { %v3229_v18 = vpop.xlane.xlu0 %3228 }
0x13c5   : > { %v3230_v19 = vmul.f32 0.03125, %v3229_v18 }
0x13c7   : > { %v3231_v20 = vsub.f32 %v3226_v13, %v3230_v19 }
0x13c9   : > { %v3232_v21 = vmul.f32 %v3231_v20, %v3231_v20 }
0x13cb   : > { %v3233_v24 = vsel %vm545_vm3, %v3232_v21, 0.0 }
0x13cc   : > { %3234 = vadd.xlane.f32.xlu1 %v3233_v24 }
0x1459   : > { %v3235_v40 = vpop.xlane.xlu1 %3234 }
0x145a   : > { %v3236_v26 = vmul.f32 0.03125, %v3235_v40 }
0x145c   : > { %v3237_v29 = vadd.f32 1e-05, %v3236_v26 }
0x145e   : > { %3912 = vrsqrt.f32 %v3237_v29 }
0x1468   : > { %v3913_v12 = vpop.eup %3912 }
0x1469   : > { %v3239_v22 = vmul.f32 %v3913_v12, %v3231_v20 }
0x146b   : > { %v3244_v47 = vmul.f32 %v3243_v11, %v3239_v22 }
0x146d   : > { %v3249_v31 = vadd.f32 %v3248_v2, %v3244_v47 }
0x146f   : > { %v3250_v32 = vpack.c.bf16 %v3249_v31, %v3249_v31 }
0x1471   : > { %3781 = vmatmul.mubr.msk.bf16.vlgmr.msra.gmra.mrb[52].mxu1 %vm545_vm3, %v3250_v32 }
0x1544   : > { %v3304_v35 = vpop.f32.mrb[52].mxu1 }
0x1545   : > { %3310 = vst [vmem:[%s390_s24] sm:$0xff] %v3304_v35  ;;  %v3782_v14 = vpop.f32.mrb[53].mxu1 }
0x1546   : > { %v3307_v15 = vpop.f32.mrb[54].mxu1 }
0x1547   : > { %3927 = shalt.err (!%p3924_p3)
}
0x1548   : > { %s3928_s14 = scalar_lea.hbm %s4697_s13, 128  ;;  %s3932_s12 = scalar_lea.hbm %s4748_s11, 256 }
0x1549   : > { %p3929_p4 = scmp.ne.s32.totalorder %s4697_s13, %s3928_s14  ;;  %p3933_p9 = scmp.lt.u32.totalorder %s4697_s13, %s4748_s11 }
0x154a   : > { %p3934_p10 = scmp.lt.u32.totalorder %s3932_s12, %s3928_s14  ;;  %p3936_p12 = scmp.lt.u32.totalorder %s3928_s14, %s4697_s13 }
0x154b   : > { %p3930_p7 = pnand %p3929_p4, %p4097_p5 }
0x154c   : > { %p3935_p11 = por %p3934_p10, %p3933_p9 }
0x154d   : > { %p3931_p8 = pneg %p3930_p7 }
0x154e   : > { %p3937_p13 = por %p3936_p12, %p3935_p11 }
0x1550   : > { %p3938_p0 = pnand %p3937_p13, %p3931_p8 }
0x1552   : > { %3941 = shalt.err (!%p3938_p0)
}
0x1553   : > { %3784 = dma.vmem_to_hbm [thread:$0]  (%p4097_p5), %s4692_s25, 128, %s4697_s13, %s3312_s16   ;;  %v3783_v30 = vpop.f32.mrb[55].mxu1 }
0x1554 PF: > { %p3790_p1 = scmp.ge.s32.totalorder %s3976_s20, 2  ;;  %s3337_s0 = sand.u32 1, %s3964_s17  }
0x1555   : > { %s3338_s15 = scalar_lea.sflag [#allocation3], %s3337_s0 }
0x1556   : > { %p3787_p2 = pnand %p3790_p1, %p4101_p6 }
0x1558   : > { %3959 = dma.done.wait (!%p3787_p2), %s3338_s15, 128  }
0x1559   : > { %3961 = vsyncadd (!%p3787_p2), %s3338_s15, 4294967168  ;;  %p21_p3 = scmp.ge.s32.totalorder %s4084_s23, 4   ;;  %s4779_s17 = smov %s3968_s18 }
0x155a   : > { %s4780_s18 = smov %s3972_s19  ;;  %s4781_s19 = smov %s4095_s26 }
0x155b   : > { %s4782_s20 = smov %s4084_s23  ;;  %23 = sbr.rel (!%p21_p3) target bundleno = 5 (0x5), region = 109 }
0x1562   :  { %3343 = vsyncpa [#allocation3], 1 }
0x1563   :  { %3345 = vsyncpa [#allocation3 + $0x1], 1 }

</bundles_post_ra>
